<compile_context>
chip_gen: v7x
topology: tpu7x:2x2x1
jax: 0.10.0
libtpu: 0.0.40
codegen_flags: <defaults>
</compile_context>

<pallas_src>
import functools
import math

import numpy as np

import jax
import jax.numpy as jnp
from jax.experimental import pallas as pl
from jax.experimental.pallas import tpu as pltpu

_PADDED_CLASSES = 128  # lane-dense final store; wrapper slices to num_classes


def _full_spec(shape):
    """BlockSpec covering the entire array (single grid step)."""
    nd = len(shape)
    return pl.BlockSpec(shape, lambda i, _nd=nd: (0,) * _nd)


# ---------------------------------------------------------------------------
# In-kernel building blocks (pure value-level: no scratch, no masked stores)
# ---------------------------------------------------------------------------
def _conv3x3_band_relu(x3, bw_ref, b_ref):
    """3x3 stride-1 'same' conv + bias + ReLU on channel-planar rows.

    x3:     (N, H, Cin*W) bf16, lane = ci*W + w
    bw_ref: (3, Cin*W, Cout*W) bf16 banded weights (dy = 0,1,2); the band encodes
            the dx shifts and the horizontal zero padding.
    b_ref:  (1, Cout*W) f32 bias, pre-tiled per lane.
    Returns (N, H, Cout*W) f32.
    """
    n, h, lin = x3.shape
    lout = bw_ref.shape[2]
    zrow = jnp.zeros((n, 1, lin), x3.dtype)
    x_up = jnp.concatenate([zrow, x3[:, : h - 1, :]], axis=1)   # input row h-1 (dy=0)
    x_dn = jnp.concatenate([x3[:, 1:, :], zrow], axis=1)        # input row h+1 (dy=2)
    acc = jnp.dot(x_up.reshape(n * h, lin), bw_ref[0],
                  preferred_element_type=jnp.float32)
    acc += jnp.dot(x3.reshape(n * h, lin), bw_ref[1],
                   preferred_element_type=jnp.float32)
    acc += jnp.dot(x_dn.reshape(n * h, lin), bw_ref[2],
                   preferred_element_type=jnp.float32)
    return jnp.maximum(acc + b_ref[...], 0.0).reshape(n, h, lout)


def _maxpool2x2(y, sel_ref):
    """2x2 / stride-2 max pool on channel-planar rows, staying lane-dense.

    y:       (N, H, C*W) f32 (post-ReLU)
    sel_ref: (C*W, C*(W//2)) bf16 0/1 matrix selecting the even-w lanes.
    Returns  (N, H//2, C*(W//2)) f32.
    """
    n, h, l = y.shape
    lp = sel_ref.shape[1]
    # Pair-max along W: lane l vs lane l+1 (wrap element lands on a discarded
    # odd-w position).  Then compact even-w lanes with one MXU selection matmul.
    shifted = jnp.concatenate([y[:, :, 1:], y[:, :, :1]], axis=2)
    m = jnp.maximum(y, shifted)
    z = jnp.dot(m.reshape(n * h, l).astype(jnp.bfloat16), sel_ref[...],
                preferred_element_type=jnp.float32)
    # Pair-max along H (row pairs within each image).
    z = z.reshape(n, h // 2, 2, lp)
    return jnp.maximum(z[:, :, 0, :], z[:, :, 1, :])


def _vgg_fused_kernel(x_ref,
                      bw1_ref, b1_ref, s1_ref,
                      bw2_ref, b2_ref, s2_ref,
                      fc1w_ref, fc1b_ref, fc2w_ref, fc2b_ref,
                      faw_ref, fab_ref,
                      o_ref):
    n, c0, h1, w1 = x_ref.shape

    # NCHW -> channel-planar rows (N, H, C*W), lane = c*W + w; done in-kernel
    # (no wrapper-side transpose / HBM round trip; C0 is tiny).
    x3 = jnp.concatenate([x_ref[:, c, :, :] for c in range(c0)],
                         axis=-1).astype(jnp.bfloat16)

    # conv1 + ReLU + 2x2 pool
    y = _conv3x3_band_relu(x3, bw1_ref, b1_ref)        # (N, H1, C1*W1) f32
    y = _maxpool2x2(y, s1_ref)                          # (N, H2, C1*W2) f32

    # conv2 + ReLU + 2x2 pool
    y = _conv3x3_band_relu(y.astype(jnp.bfloat16), bw2_ref, b2_ref)
    y = _maxpool2x2(y, s2_ref)                          # (N, H3, C2*W3) f32

    # Flatten: value-level reshape (lane-dense, W3*C2 = 128); fc1 rows were
    # permuted at prep time to this (h, c, w) order.
    f = y.reshape(n, y.shape[1] * y.shape[2]).astype(jnp.bfloat16)

    # classifier + fc_action (bf16 MXU operands, f32 accumulation)
    h = jnp.dot(f, fc1w_ref[...], preferred_element_type=jnp.float32)
    h = jnp.maximum(h + fc1b_ref[...], 0.0)
    # TODO(synk): nn.Dropout(p=0.9) — eval-mode identity (no RNG masking).
    h = jnp.dot(h.astype(jnp.bfloat16), fc2w_ref[...],
                preferred_element_type=jnp.float32)
    h = jnp.maximum(h + fc2b_ref[...], 0.0)
    # TODO(synk): nn.Dropout(p=0.8) — eval-mode identity (no RNG masking).
    out = jnp.dot(h.astype(jnp.bfloat16), faw_ref[...],
                  preferred_element_type=jnp.float32)
    o_ref[...] = out + fab_ref[...]                     # unmasked 128-lane store


# ---------------------------------------------------------------------------
# Canonical (PyTorch-layout) parameter init, mirroring VGG._initialize_weights
# ---------------------------------------------------------------------------
def init_params(key, num_classes=10):
    ks = jax.random.split(key, 5)

    def conv_w(k, cout, cin):
        std = math.sqrt(2.0 / (3 * 3 * cout))
        return std * jax.random.normal(k, (cout, cin, 3, 3), jnp.float32)  # OIHW

    def lin_w(k, fout, fin):
        return 0.01 * jax.random.normal(k, (fout, fin), jnp.float32)

    return {
        "conv1_w": conv_w(ks[0], 16, 4), "conv1_b": jnp.zeros((16,), jnp.float32),
        "conv2_w": conv_w(ks[1], 32, 16), "conv2_b": jnp.zeros((32,), jnp.float32),
        "fc1_w": lin_w(ks[2], 128, 512), "fc1_b": jnp.zeros((128,), jnp.float32),
        "fc2_w": lin_w(ks[3], 128, 128), "fc2_b": jnp.zeros((128,), jnp.float32),
        "fc_action_w": lin_w(ks[4], num_classes, 128),
        "fc_action_b": jnp.zeros((num_classes,), jnp.float32),
    }


# ---------------------------------------------------------------------------
# One-time transform into the kernel's lane-dense layouts
# ---------------------------------------------------------------------------
def _band_weights(w_oihw, width):
    """BW[dy][ci*W + wi, co*W + wo] = w[co, ci, dy, dx], wi = wo + dx - 1.

    Entries with wi outside [0, W) stay zero -> horizontal 'same' padding is
    encoded in the band, not in the data."""
    w = np.asarray(w_oihw, np.float32)
    cout, cin = w.shape[0], w.shape[1]
    bw = np.zeros((3, cin * width, cout * width), np.float32)
    rows = np.arange(cin) * width
    cols = np.arange(cout) * width
    for dy in range(3):
        for dx in range(3):
            blk = w[:, :, dy, dx].T                     # (cin, cout)
            for wo in range(width):
                wi = wo + dx - 1
                if 0 <= wi < width:
                    bw[dy][np.ix_(rows + wi, cols + wo)] = blk
    return jnp.asarray(bw, jnp.bfloat16)


def _pool_even_selection(channels, width):
    """0/1 matrix compacting even-w lanes: (C*W) -> (C*(W//2))."""
    half = width // 2
    s = np.zeros((channels * width, channels * half), np.float32)
    for c in range(channels):
        for wp in range(half):
            s[c * width + 2 * wp, c * half + wp] = 1.0
    return jnp.asarray(s, jnp.bfloat16)


def prepare_kernel_params(params, *, height=16, width=16,
                          padded_classes=_PADDED_CLASSES):
    c1, c0 = params["conv1_w"].shape[:2]
    c2 = params["conv2_w"].shape[0]
    w1, w2, w3 = width, width // 2, width // 4
    h3 = height // 4
    num_classes = params["fc_action_w"].shape[0]

    # fc1 row permutation: kernel flatten order (h, c, w) -> PyTorch order (c, h, w)
    perm = np.zeros(c2 * h3 * w3, np.int32)
    for h in range(h3):
        for c in range(c2):
            for w in range(w3):
                perm[(h * c2 + c) * w3 + w] = (c * h3 + h) * w3 + w
    fc1_w = np.asarray(params["fc1_w"], np.float32).T[perm]          # (512, 128)

    fa_w = np.zeros((params["fc_action_w"].shape[1], padded_classes), np.float32)
    fa_w[:, :num_classes] = np.asarray(params["fc_action_w"], np.float32).T
    fa_b = np.zeros((1, padded_classes), np.float32)
    fa_b[0, :num_classes] = np.asarray(params["fc_action_b"], np.float32)

    def tile_bias(b, w):
        return jnp.asarray(np.repeat(np.asarray(b, np.float32), w)[None, :],
                           jnp.float32)

    return {
        "conv1_bw": _band_weights(params["conv1_w"], w1),            # (3, 64, 256)
        "conv1_b": tile_bias(params["conv1_b"], w1),                 # (1, 256)
        "pool1_sel": _pool_even_selection(c1, w1),                   # (256, 128)
        "conv2_bw": _band_weights(params["conv2_w"], w2),            # (3, 128, 256)
        "conv2_b": tile_bias(params["conv2_b"], w2),                 # (1, 256)
        "pool2_sel": _pool_even_selection(c2, w2),                   # (256, 128)
        "fc1_w": jnp.asarray(fc1_w, jnp.bfloat16),                   # (512, 128)
        "fc1_b": jnp.asarray(np.asarray(params["fc1_b"], np.float32)[None, :]),
        "fc2_w": jnp.asarray(np.asarray(params["fc2_w"], np.float32).T, jnp.bfloat16),
        "fc2_b": jnp.asarray(np.asarray(params["fc2_b"], np.float32)[None, :]),
        "fc_action_w": jnp.asarray(fa_w, jnp.bfloat16),              # (128, 128)
        "fc_action_b": jnp.asarray(fa_b, jnp.float32),               # (1, 128)
    }


# ---------------------------------------------------------------------------
# Forward: ONE fused pallas_call (features -> flatten -> classifier -> fc_action)
# ---------------------------------------------------------------------------
@functools.partial(jax.jit, static_argnames=("num_classes",))
def vgg_forward(x_nchw, kp, *, num_classes=10):
    x = x_nchw.astype(jnp.float32)                     # PyTorch NCHW, no transpose
    n = x.shape[0]
    pad_classes = kp["fc_action_w"].shape[1]

    args = (x,
            kp["conv1_bw"], kp["conv1_b"], kp["pool1_sel"],
            kp["conv2_bw"], kp["conv2_b"], kp["pool2_sel"],
            kp["fc1_w"], kp["fc1_b"], kp["fc2_w"], kp["fc2_b"],
            kp["fc_action_w"], kp["fc_action_b"])

    out = pl.pallas_call(
        _vgg_fused_kernel,
        grid=(1,),
        in_specs=[_full_spec(a.shape) for a in args],
        out_specs=_full_spec((n, pad_classes)),
        out_shape=jax.ShapeDtypeStruct((n, pad_classes), jnp.float32),
        compiler_params=pltpu.CompilerParams(
            dimension_semantics=("arbitrary",)),
    )(*args)
    return out[:, :num_classes]


# ---------------------------------------------------------------------------
# Pure-JAX f32 reference (same eval-mode semantics) for a correctness check
# ---------------------------------------------------------------------------
def vgg_reference(x, params):
    hp = jax.lax.Precision.HIGHEST

    def conv_block(y, w, b):
        y = jax.lax.conv_general_dilated(
            y, w, (1, 1), "SAME",
            dimension_numbers=("NCHW", "OIHW", "NCHW"), precision=hp)
        y = jnp.maximum(y + b[None, :, None, None], 0.0)
        return jax.lax.reduce_window(y, -jnp.inf, jax.lax.max,
                                     (1, 1, 2, 2), (1, 1, 2, 2), "VALID")

    y = conv_block(x.astype(jnp.float32), params["conv1_w"], params["conv1_b"])
    y = conv_block(y, params["conv2_w"], params["conv2_b"])
    f = y.reshape(y.shape[0], -1)
    h = jnp.maximum(jnp.dot(f, params["fc1_w"].T, precision=hp) + params["fc1_b"], 0.0)
    h = jnp.maximum(jnp.dot(h, params["fc2_w"].T, precision=hp) + params["fc2_b"], 0.0)
    return jnp.dot(h, params["fc_action_w"].T, precision=hp) + params["fc_action_b"]


if __name__ == "__main__":
    key = jax.random.PRNGKey(0)
    k_x, k_p = jax.random.split(key)
    x = jax.random.normal(k_x, (2, 4, 16, 16), jnp.float32)     # NCHW, like PyTorch
    params = init_params(k_p, num_classes=10)
    kparams = prepare_kernel_params(params, height=16, width=16)

    out = vgg_forward(x, kparams, num_classes=10)
    jax.block_until_ready(out)
    assert out.shape == (2, 10) and out.dtype == jnp.float32

    # Correctness vs pure-JAX f32 reference (kernel uses bf16 MXU operands).
    ref = vgg_reference(x, params)
    err = float(jnp.max(jnp.abs(out - ref)))
    tol = 5e-4 + 0.1 * float(jnp.max(jnp.abs(ref)))
    assert err <= tol, f"kernel vs reference mismatch: {err} > {tol}"

    print("KERNEL_OK")
</pallas_src>

<mosaic_0001>
module attributes {stable_mosaic.version = 11 : i64} {
  func.func @_vgg_fused_kernel(%arg0: i32, %arg1: memref<2x4x16x16xf32, #tpu.memory_space<vmem>>, %arg2: memref<3x64x256xbf16, #tpu.memory_space<vmem>>, %arg3: memref<1x256xf32, #tpu.memory_space<vmem>>, %arg4: memref<256x128xbf16, #tpu.memory_space<vmem>>, %arg5: memref<3x128x256xbf16, #tpu.memory_space<vmem>>, %arg6: memref<1x256xf32, #tpu.memory_space<vmem>>, %arg7: memref<256x128xbf16, #tpu.memory_space<vmem>>, %arg8: memref<512x128xbf16, #tpu.memory_space<vmem>>, %arg9: memref<1x128xf32, #tpu.memory_space<vmem>>, %arg10: memref<128x128xbf16, #tpu.memory_space<vmem>>, %arg11: memref<1x128xf32, #tpu.memory_space<vmem>>, %arg12: memref<128x128xbf16, #tpu.memory_space<vmem>>, %arg13: memref<1x128xf32, #tpu.memory_space<vmem>>, %arg14: memref<2x128xf32, #tpu.memory_space<vmem>>) attributes {dimension_semantics = [#tpu.dimension_semantics<arbitrary>], iteration_bounds = array<i64: 1>, scalar_prefetch = 0 : i64, scratch_operands = 0 : i64, tpu.core_type = #tpu.core_type<tc>, window_params = [{pipeline_mode = #tpu.pipeline_mode<synchronous>, transform_indices = @transform_0, window_bounds = array<i64: 2, 4, 16, 16>}, {pipeline_mode = #tpu.pipeline_mode<synchronous>, transform_indices = @transform_1, window_bounds = array<i64: 3, 64, 256>}, {pipeline_mode = #tpu.pipeline_mode<synchronous>, transform_indices = @transform_2, window_bounds = array<i64: 1, 256>}, {pipeline_mode = #tpu.pipeline_mode<synchronous>, transform_indices = @transform_3, window_bounds = array<i64: 256, 128>}, {pipeline_mode = #tpu.pipeline_mode<synchronous>, transform_indices = @transform_4, window_bounds = array<i64: 3, 128, 256>}, {pipeline_mode = #tpu.pipeline_mode<synchronous>, transform_indices = @transform_5, window_bounds = array<i64: 1, 256>}, {pipeline_mode = #tpu.pipeline_mode<synchronous>, transform_indices = @transform_6, window_bounds = array<i64: 256, 128>}, {pipeline_mode = #tpu.pipeline_mode<synchronous>, transform_indices = @transform_7, window_bounds = array<i64: 512, 128>}, {pipeline_mode = #tpu.pipeline_mode<synchronous>, transform_indices = @transform_8, window_bounds = array<i64: 1, 128>}, {pipeline_mode = #tpu.pipeline_mode<synchronous>, transform_indices = @transform_9, window_bounds = array<i64: 128, 128>}, {pipeline_mode = #tpu.pipeline_mode<synchronous>, transform_indices = @transform_10, window_bounds = array<i64: 1, 128>}, {pipeline_mode = #tpu.pipeline_mode<synchronous>, transform_indices = @transform_11, window_bounds = array<i64: 128, 128>}, {pipeline_mode = #tpu.pipeline_mode<synchronous>, transform_indices = @transform_12, window_bounds = array<i64: 1, 128>}, {pipeline_mode = #tpu.pipeline_mode<synchronous>, transform_indices = @transform_13, window_bounds = array<i64: 2, 128>}]} {
    %c0 = arith.constant 0 : index
    %c0_0 = arith.constant 0 : index
    %c0_1 = arith.constant 0 : index
    %c0_2 = arith.constant 0 : index
    %0 = vector.load %arg1[%c0, %c0_0, %c0_1, %c0_2] : memref<2x4x16x16xf32, #tpu.memory_space<vmem>>, vector<2x1x16x16xf32>
    %1 = vector.shape_cast %0 : vector<2x1x16x16xf32> to vector<2x16x16xf32>
    %c0_3 = arith.constant 0 : index
    %c1 = arith.constant 1 : index
    %c0_4 = arith.constant 0 : index
    %c0_5 = arith.constant 0 : index
    %2 = vector.load %arg1[%c0_3, %c1, %c0_4, %c0_5] : memref<2x4x16x16xf32, #tpu.memory_space<vmem>>, vector<2x1x16x16xf32>
    %3 = vector.shape_cast %2 : vector<2x1x16x16xf32> to vector<2x16x16xf32>
    %c0_6 = arith.constant 0 : index
    %c2 = arith.constant 2 : index
    %c0_7 = arith.constant 0 : index
    %c0_8 = arith.constant 0 : index
    %4 = vector.load %arg1[%c0_6, %c2, %c0_7, %c0_8] : memref<2x4x16x16xf32, #tpu.memory_space<vmem>>, vector<2x1x16x16xf32>
    %5 = vector.shape_cast %4 : vector<2x1x16x16xf32> to vector<2x16x16xf32>
    %c0_9 = arith.constant 0 : index
    %c3 = arith.constant 3 : index
    %c0_10 = arith.constant 0 : index
    %c0_11 = arith.constant 0 : index
    %6 = vector.load %arg1[%c0_9, %c3, %c0_10, %c0_11] : memref<2x4x16x16xf32, #tpu.memory_space<vmem>>, vector<2x1x16x16xf32>
    %7 = vector.shape_cast %6 : vector<2x1x16x16xf32> to vector<2x16x16xf32>
    %8 = tpu.concatenate %1, %3, %5, %7 in 2 : vector<2x16x16xf32>, vector<2x16x16xf32>, vector<2x16x16xf32>, vector<2x16x16xf32> -> vector<2x16x64xf32>
    %9 = arith.truncf %8 : vector<2x16x64xf32> to vector<2x16x64xbf16>
    %cst = arith.constant 0.000000e+00 : bf16
    %10 = vector.broadcast %cst : bf16 to vector<2x1x64xbf16>
    %11 = vector.extract_strided_slice %9 {offsets = [0, 0, 0], sizes = [2, 15, 64], strides = [1, 1, 1]} : vector<2x16x64xbf16> to vector<2x15x64xbf16>
    %12 = tpu.concatenate %10, %11 in 1 : vector<2x1x64xbf16>, vector<2x15x64xbf16> -> vector<2x16x64xbf16>
    %13 = vector.extract_strided_slice %9 {offsets = [0, 1, 0], sizes = [2, 15, 64], strides = [1, 1, 1]} : vector<2x16x64xbf16> to vector<2x15x64xbf16>
    %14 = tpu.concatenate %13, %10 in 1 : vector<2x15x64xbf16>, vector<2x1x64xbf16> -> vector<2x16x64xbf16>
    %15 = vector.shape_cast %12 : vector<2x16x64xbf16> to vector<32x64xbf16>
    %c0_12 = arith.constant 0 : index
    %c0_13 = arith.constant 0 : index
    %c0_14 = arith.constant 0 : index
    %16 = vector.load %arg2[%c0_12, %c0_13, %c0_14] : memref<3x64x256xbf16, #tpu.memory_space<vmem>>, vector<1x64x256xbf16>
    %17 = vector.shape_cast %16 : vector<1x64x256xbf16> to vector<64x256xbf16>
    %cst_15 = arith.constant dense<0.000000e+00> : vector<32x256xf32>
    %18 = tpu.matmul %15, %17, %cst_15 {dimension_numbers = #tpu.dot_dimension_numbers<[1], [0], [0], [1], [0, 0, 1, 1], [], []>} : vector<32x64xbf16>, vector<64x256xbf16>, vector<32x256xf32> -> vector<32x256xf32>
    %19 = vector.shape_cast %9 : vector<2x16x64xbf16> to vector<32x64xbf16>
    %c1_16 = arith.constant 1 : index
    %c0_17 = arith.constant 0 : index
    %c0_18 = arith.constant 0 : index
    %20 = vector.load %arg2[%c1_16, %c0_17, %c0_18] : memref<3x64x256xbf16, #tpu.memory_space<vmem>>, vector<1x64x256xbf16>
    %21 = vector.shape_cast %20 : vector<1x64x256xbf16> to vector<64x256xbf16>
    %cst_19 = arith.constant dense<0.000000e+00> : vector<32x256xf32>
    %22 = tpu.matmul %19, %21, %cst_19 {dimension_numbers = #tpu.dot_dimension_numbers<[1], [0], [0], [1], [0, 0, 1, 1], [], []>} : vector<32x64xbf16>, vector<64x256xbf16>, vector<32x256xf32> -> vector<32x256xf32>
    %23 = arith.addf %18, %22 : vector<32x256xf32>
    %24 = vector.shape_cast %14 : vector<2x16x64xbf16> to vector<32x64xbf16>
    %c2_20 = arith.constant 2 : index
    %c0_21 = arith.constant 0 : index
    %c0_22 = arith.constant 0 : index
    %25 = vector.load %arg2[%c2_20, %c0_21, %c0_22] : memref<3x64x256xbf16, #tpu.memory_space<vmem>>, vector<1x64x256xbf16>
    %26 = vector.shape_cast %25 : vector<1x64x256xbf16> to vector<64x256xbf16>
    %cst_23 = arith.constant dense<0.000000e+00> : vector<32x256xf32>
    %27 = tpu.matmul %24, %26, %cst_23 {dimension_numbers = #tpu.dot_dimension_numbers<[1], [0], [0], [1], [0, 0, 1, 1], [], []>} : vector<32x64xbf16>, vector<64x256xbf16>, vector<32x256xf32> -> vector<32x256xf32>
    %28 = arith.addf %23, %27 : vector<32x256xf32>
    %c0_24 = arith.constant 0 : index
    %c0_25 = arith.constant 0 : index
    %29 = vector.load %arg3[%c0_24, %c0_25] : memref<1x256xf32, #tpu.memory_space<vmem>>, vector<1x256xf32>
    %30 = vector.broadcast %29 : vector<1x256xf32> to vector<32x256xf32>
    %31 = arith.addf %28, %30 : vector<32x256xf32>
    %cst_26 = arith.constant 0.000000e+00 : f32
    %32 = vector.broadcast %cst_26 : f32 to vector<32x256xf32>
    %33 = arith.maximumf %31, %32 : vector<32x256xf32>
    %34 = vector.shape_cast %33 : vector<32x256xf32> to vector<2x16x256xf32>
    %35 = vector.extract_strided_slice %34 {offsets = [0, 0, 1], sizes = [2, 16, 255], strides = [1, 1, 1]} : vector<2x16x256xf32> to vector<2x16x255xf32>
    %36 = vector.extract_strided_slice %34 {offsets = [0, 0, 0], sizes = [2, 16, 1], strides = [1, 1, 1]} : vector<2x16x256xf32> to vector<2x16x1xf32>
    %37 = tpu.concatenate %35, %36 in 2 : vector<2x16x255xf32>, vector<2x16x1xf32> -> vector<2x16x256xf32>
    %38 = arith.maximumf %34, %37 : vector<2x16x256xf32>
    %39 = vector.shape_cast %38 : vector<2x16x256xf32> to vector<32x256xf32>
    %40 = arith.truncf %39 : vector<32x256xf32> to vector<32x256xbf16>
    %c0_27 = arith.constant 0 : index
    %c0_28 = arith.constant 0 : index
    %41 = vector.load %arg4[%c0_27, %c0_28] : memref<256x128xbf16, #tpu.memory_space<vmem>>, vector<256x128xbf16>
    %cst_29 = arith.constant dense<0.000000e+00> : vector<32x128xf32>
    %42 = tpu.matmul %40, %41, %cst_29 {dimension_numbers = #tpu.dot_dimension_numbers<[1], [0], [0], [1], [0, 0, 1, 1], [], []>} : vector<32x256xbf16>, vector<256x128xbf16>, vector<32x128xf32> -> vector<32x128xf32>
    %43 = vector.shape_cast %42 : vector<32x128xf32> to vector<2x8x2x128xf32>
    %44 = vector.extract_strided_slice %43 {offsets = [0, 0, 0, 0], sizes = [2, 8, 1, 128], strides = [1, 1, 1, 1]} : vector<2x8x2x128xf32> to vector<2x8x1x128xf32>
    %45 = vector.shape_cast %44 : vector<2x8x1x128xf32> to vector<2x8x128xf32>
    %46 = vector.extract_strided_slice %43 {offsets = [0, 0, 1, 0], sizes = [2, 8, 1, 128], strides = [1, 1, 1, 1]} : vector<2x8x2x128xf32> to vector<2x8x1x128xf32>
    %47 = vector.shape_cast %46 : vector<2x8x1x128xf32> to vector<2x8x128xf32>
    %48 = arith.maximumf %45, %47 : vector<2x8x128xf32>
    %49 = arith.truncf %48 : vector<2x8x128xf32> to vector<2x8x128xbf16>
    %cst_30 = arith.constant 0.000000e+00 : bf16
    %50 = vector.broadcast %cst_30 : bf16 to vector<2x1x128xbf16>
    %51 = vector.extract_strided_slice %49 {offsets = [0, 0, 0], sizes = [2, 7, 128], strides = [1, 1, 1]} : vector<2x8x128xbf16> to vector<2x7x128xbf16>
    %52 = tpu.concatenate %50, %51 in 1 : vector<2x1x128xbf16>, vector<2x7x128xbf16> -> vector<2x8x128xbf16>
    %53 = vector.extract_strided_slice %49 {offsets = [0, 1, 0], sizes = [2, 7, 128], strides = [1, 1, 1]} : vector<2x8x128xbf16> to vector<2x7x128xbf16>
    %54 = tpu.concatenate %53, %50 in 1 : vector<2x7x128xbf16>, vector<2x1x128xbf16> -> vector<2x8x128xbf16>
    %55 = vector.shape_cast %52 : vector<2x8x128xbf16> to vector<16x128xbf16>
    %c0_31 = arith.constant 0 : index
    %c0_32 = arith.constant 0 : index
    %c0_33 = arith.constant 0 : index
    %56 = vector.load %arg5[%c0_31, %c0_32, %c0_33] : memref<3x128x256xbf16, #tpu.memory_space<vmem>>, vector<1x128x256xbf16>
    %57 = vector.shape_cast %56 : vector<1x128x256xbf16> to vector<128x256xbf16>
    %cst_34 = arith.constant dense<0.000000e+00> : vector<16x256xf32>
    %58 = tpu.matmul %55, %57, %cst_34 {dimension_numbers = #tpu.dot_dimension_numbers<[1], [0], [0], [1], [0, 0, 1, 1], [], []>} : vector<16x128xbf16>, vector<128x256xbf16>, vector<16x256xf32> -> vector<16x256xf32>
    %59 = vector.shape_cast %49 : vector<2x8x128xbf16> to vector<16x128xbf16>
    %c1_35 = arith.constant 1 : index
    %c0_36 = arith.constant 0 : index
    %c0_37 = arith.constant 0 : index
    %60 = vector.load %arg5[%c1_35, %c0_36, %c0_37] : memref<3x128x256xbf16, #tpu.memory_space<vmem>>, vector<1x128x256xbf16>
    %61 = vector.shape_cast %60 : vector<1x128x256xbf16> to vector<128x256xbf16>
    %cst_38 = arith.constant dense<0.000000e+00> : vector<16x256xf32>
    %62 = tpu.matmul %59, %61, %cst_38 {dimension_numbers = #tpu.dot_dimension_numbers<[1], [0], [0], [1], [0, 0, 1, 1], [], []>} : vector<16x128xbf16>, vector<128x256xbf16>, vector<16x256xf32> -> vector<16x256xf32>
    %63 = arith.addf %58, %62 : vector<16x256xf32>
    %64 = vector.shape_cast %54 : vector<2x8x128xbf16> to vector<16x128xbf16>
    %c2_39 = arith.constant 2 : index
    %c0_40 = arith.constant 0 : index
    %c0_41 = arith.constant 0 : index
    %65 = vector.load %arg5[%c2_39, %c0_40, %c0_41] : memref<3x128x256xbf16, #tpu.memory_space<vmem>>, vector<1x128x256xbf16>
    %66 = vector.shape_cast %65 : vector<1x128x256xbf16> to vector<128x256xbf16>
    %cst_42 = arith.constant dense<0.000000e+00> : vector<16x256xf32>
    %67 = tpu.matmul %64, %66, %cst_42 {dimension_numbers = #tpu.dot_dimension_numbers<[1], [0], [0], [1], [0, 0, 1, 1], [], []>} : vector<16x128xbf16>, vector<128x256xbf16>, vector<16x256xf32> -> vector<16x256xf32>
    %68 = arith.addf %63, %67 : vector<16x256xf32>
    %c0_43 = arith.constant 0 : index
    %c0_44 = arith.constant 0 : index
    %69 = vector.load %arg6[%c0_43, %c0_44] : memref<1x256xf32, #tpu.memory_space<vmem>>, vector<1x256xf32>
    %70 = vector.broadcast %69 : vector<1x256xf32> to vector<16x256xf32>
    %71 = arith.addf %68, %70 : vector<16x256xf32>
    %cst_45 = arith.constant 0.000000e+00 : f32
    %72 = vector.broadcast %cst_45 : f32 to vector<16x256xf32>
    %73 = arith.maximumf %71, %72 : vector<16x256xf32>
    %74 = vector.shape_cast %73 : vector<16x256xf32> to vector<2x8x256xf32>
    %75 = vector.extract_strided_slice %74 {offsets = [0, 0, 1], sizes = [2, 8, 255], strides = [1, 1, 1]} : vector<2x8x256xf32> to vector<2x8x255xf32>
    %76 = vector.extract_strided_slice %74 {offsets = [0, 0, 0], sizes = [2, 8, 1], strides = [1, 1, 1]} : vector<2x8x256xf32> to vector<2x8x1xf32>
    %77 = tpu.concatenate %75, %76 in 2 : vector<2x8x255xf32>, vector<2x8x1xf32> -> vector<2x8x256xf32>
    %78 = arith.maximumf %74, %77 : vector<2x8x256xf32>
    %79 = vector.shape_cast %78 : vector<2x8x256xf32> to vector<16x256xf32>
    %80 = arith.truncf %79 : vector<16x256xf32> to vector<16x256xbf16>
    %c0_46 = arith.constant 0 : index
    %c0_47 = arith.constant 0 : index
    %81 = vector.load %arg7[%c0_46, %c0_47] : memref<256x128xbf16, #tpu.memory_space<vmem>>, vector<256x128xbf16>
    %cst_48 = arith.constant dense<0.000000e+00> : vector<16x128xf32>
    %82 = tpu.matmul %80, %81, %cst_48 {dimension_numbers = #tpu.dot_dimension_numbers<[1], [0], [0], [1], [0, 0, 1, 1], [], []>} : vector<16x256xbf16>, vector<256x128xbf16>, vector<16x128xf32> -> vector<16x128xf32>
    %83 = vector.shape_cast %82 : vector<16x128xf32> to vector<2x4x2x128xf32>
    %84 = vector.extract_strided_slice %83 {offsets = [0, 0, 0, 0], sizes = [2, 4, 1, 128], strides = [1, 1, 1, 1]} : vector<2x4x2x128xf32> to vector<2x4x1x128xf32>
    %85 = vector.shape_cast %84 : vector<2x4x1x128xf32> to vector<2x4x128xf32>
    %86 = vector.extract_strided_slice %83 {offsets = [0, 0, 1, 0], sizes = [2, 4, 1, 128], strides = [1, 1, 1, 1]} : vector<2x4x2x128xf32> to vector<2x4x1x128xf32>
    %87 = vector.shape_cast %86 : vector<2x4x1x128xf32> to vector<2x4x128xf32>
    %88 = arith.maximumf %85, %87 : vector<2x4x128xf32>
    %89 = vector.shape_cast %88 : vector<2x4x128xf32> to vector<2x512xf32>
    %90 = arith.truncf %89 : vector<2x512xf32> to vector<2x512xbf16>
    %c0_49 = arith.constant 0 : index
    %c0_50 = arith.constant 0 : index
    %91 = vector.load %arg8[%c0_49, %c0_50] : memref<512x128xbf16, #tpu.memory_space<vmem>>, vector<512x128xbf16>
    %cst_51 = arith.constant dense<0.000000e+00> : vector<2x128xf32>
    %92 = tpu.matmul %90, %91, %cst_51 {dimension_numbers = #tpu.dot_dimension_numbers<[1], [0], [0], [1], [0, 0, 1, 1], [], []>} : vector<2x512xbf16>, vector<512x128xbf16>, vector<2x128xf32> -> vector<2x128xf32>
    %c0_52 = arith.constant 0 : index
    %c0_53 = arith.constant 0 : index
    %93 = vector.load %arg9[%c0_52, %c0_53] : memref<1x128xf32, #tpu.memory_space<vmem>>, vector<1x128xf32>
    %94 = vector.broadcast %93 : vector<1x128xf32> to vector<2x128xf32>
    %95 = arith.addf %92, %94 : vector<2x128xf32>
    %cst_54 = arith.constant 0.000000e+00 : f32
    %96 = vector.broadcast %cst_54 : f32 to vector<2x128xf32>
    %97 = arith.maximumf %95, %96 : vector<2x128xf32>
    %98 = arith.truncf %97 : vector<2x128xf32> to vector<2x128xbf16>
    %c0_55 = arith.constant 0 : index
    %c0_56 = arith.constant 0 : index
    %99 = vector.load %arg10[%c0_55, %c0_56] : memref<128x128xbf16, #tpu.memory_space<vmem>>, vector<128x128xbf16>
    %cst_57 = arith.constant dense<0.000000e+00> : vector<2x128xf32>
    %100 = tpu.matmul %98, %99, %cst_57 {dimension_numbers = #tpu.dot_dimension_numbers<[1], [0], [0], [1], [0, 0, 1, 1], [], []>} : vector<2x128xbf16>, vector<128x128xbf16>, vector<2x128xf32> -> vector<2x128xf32>
    %c0_58 = arith.constant 0 : index
    %c0_59 = arith.constant 0 : index
    %101 = vector.load %arg11[%c0_58, %c0_59] : memref<1x128xf32, #tpu.memory_space<vmem>>, vector<1x128xf32>
    %102 = vector.broadcast %101 : vector<1x128xf32> to vector<2x128xf32>
    %103 = arith.addf %100, %102 : vector<2x128xf32>
    %cst_60 = arith.constant 0.000000e+00 : f32
    %104 = vector.broadcast %cst_60 : f32 to vector<2x128xf32>
    %105 = arith.maximumf %103, %104 : vector<2x128xf32>
    %106 = arith.truncf %105 : vector<2x128xf32> to vector<2x128xbf16>
    %c0_61 = arith.constant 0 : index
    %c0_62 = arith.constant 0 : index
    %107 = vector.load %arg12[%c0_61, %c0_62] : memref<128x128xbf16, #tpu.memory_space<vmem>>, vector<128x128xbf16>
    %cst_63 = arith.constant dense<0.000000e+00> : vector<2x128xf32>
    %108 = tpu.matmul %106, %107, %cst_63 {dimension_numbers = #tpu.dot_dimension_numbers<[1], [0], [0], [1], [0, 0, 1, 1], [], []>} : vector<2x128xbf16>, vector<128x128xbf16>, vector<2x128xf32> -> vector<2x128xf32>
    %c0_64 = arith.constant 0 : index
    %c0_65 = arith.constant 0 : index
    %109 = vector.load %arg13[%c0_64, %c0_65] : memref<1x128xf32, #tpu.memory_space<vmem>>, vector<1x128xf32>
    %110 = vector.broadcast %109 : vector<1x128xf32> to vector<2x128xf32>
    %111 = arith.addf %108, %110 : vector<2x128xf32>
    %c0_66 = arith.constant 0 : index
    %c0_67 = arith.constant 0 : index
    %112 = vector.load %arg14[%c0_66, %c0_67] : memref<2x128xf32, #tpu.memory_space<vmem>>, vector<2x128xf32>
    tpu.vector_store %arg14[%c0_66, %c0_67], %111 {strides = array<i32>} : memref<2x128xf32, #tpu.memory_space<vmem>>, vector<2x128xf32>,
    return
  }
  func.func @transform_0(%arg0: i32) -> (i32, i32, i32, i32) {
    %c0_i32 = arith.constant 0 : i32
    %c0_i32_0 = arith.constant 0 : i32
    %c0_i32_1 = arith.constant 0 : i32
    %c0_i32_2 = arith.constant 0 : i32
    %c0_i32_3 = arith.constant 0 : i32
    return %c0_i32, %c0_i32_0, %c0_i32_1, %c0_i32_2 : i32, i32, i32, i32
  }
  func.func @transform_1(%arg0: i32) -> (i32, i32, i32) {
    %c0_i32 = arith.constant 0 : i32
    %c0_i32_0 = arith.constant 0 : i32
    %c0_i32_1 = arith.constant 0 : i32
    %c0_i32_2 = arith.constant 0 : i32
    return %c0_i32, %c0_i32_0, %c0_i32_1 : i32, i32, i32
  }
  func.func @transform_2(%arg0: i32) -> (i32, i32) {
    %c0_i32 = arith.constant 0 : i32
    %c0_i32_0 = arith.constant 0 : i32
    %c0_i32_1 = arith.constant 0 : i32
    return %c0_i32, %c0_i32_0 : i32, i32
  }
  func.func @transform_3(%arg0: i32) -> (i32, i32) {
    %c0_i32 = arith.constant 0 : i32
    %c0_i32_0 = arith.constant 0 : i32
    %c0_i32_1 = arith.constant 0 : i32
    return %c0_i32, %c0_i32_0 : i32, i32
  }
  func.func @transform_4(%arg0: i32) -> (i32, i32, i32) {
    %c0_i32 = arith.constant 0 : i32
    %c0_i32_0 = arith.constant 0 : i32
    %c0_i32_1 = arith.constant 0 : i32
    %c0_i32_2 = arith.constant 0 : i32
    return %c0_i32, %c0_i32_0, %c0_i32_1 : i32, i32, i32
  }
  func.func @transform_5(%arg0: i32) -> (i32, i32) {
    %c0_i32 = arith.constant 0 : i32
    %c0_i32_0 = arith.constant 0 : i32
    %c0_i32_1 = arith.constant 0 : i32
    return %c0_i32, %c0_i32_0 : i32, i32
  }
  func.func @transform_6(%arg0: i32) -> (i32, i32) {
    %c0_i32 = arith.constant 0 : i32
    %c0_i32_0 = arith.constant 0 : i32
    %c0_i32_1 = arith.constant 0 : i32
    return %c0_i32, %c0_i32_0 : i32, i32
  }
  func.func @transform_7(%arg0: i32) -> (i32, i32) {
    %c0_i32 = arith.constant 0 : i32
    %c0_i32_0 = arith.constant 0 : i32
    %c0_i32_1 = arith.constant 0 : i32
    return %c0_i32, %c0_i32_0 : i32, i32
  }
  func.func @transform_8(%arg0: i32) -> (i32, i32) {
    %c0_i32 = arith.constant 0 : i32
    %c0_i32_0 = arith.constant 0 : i32
    %c0_i32_1 = arith.constant 0 : i32
    return %c0_i32, %c0_i32_0 : i32, i32
  }
  func.func @transform_9(%arg0: i32) -> (i32, i32) {
    %c0_i32 = arith.constant 0 : i32
    %c0_i32_0 = arith.constant 0 : i32
    %c0_i32_1 = arith.constant 0 : i32
    return %c0_i32, %c0_i32_0 : i32, i32
  }
  func.func @transform_10(%arg0: i32) -> (i32, i32) {
    %c0_i32 = arith.constant 0 : i32
    %c0_i32_0 = arith.constant 0 : i32
    %c0_i32_1 = arith.constant 0 : i32
    return %c0_i32, %c0_i32_0 : i32, i32
  }
  func.func @transform_11(%arg0: i32) -> (i32, i32) {
    %c0_i32 = arith.constant 0 : i32
    %c0_i32_0 = arith.constant 0 : i32
    %c0_i32_1 = arith.constant 0 : i32
    return %c0_i32, %c0_i32_0 : i32, i32
  }
  func.func @transform_12(%arg0: i32) -> (i32, i32) {
    %c0_i32 = arith.constant 0 : i32
    %c0_i32_0 = arith.constant 0 : i32
    %c0_i32_1 = arith.constant 0 : i32
    return %c0_i32, %c0_i32_0 : i32, i32
  }
  func.func @transform_13(%arg0: i32) -> (i32, i32) {
    %c0_i32 = arith.constant 0 : i32
    %c0_i32_0 = arith.constant 0 : i32
    %c0_i32_1 = arith.constant 0 : i32
    return %c0_i32, %c0_i32_0 : i32, i32
  }
}

</mosaic_0001>

<bundles_post_ra>
// kernel: vgg_forward.1
= control target key start
LH: loop header
LB: loop body
LE: loop exit
PB: predicated region body
PF: predicated region fallthrough
CT: control target
= control target key end

     0   :  { %18 = vsyncpa [#allocation3], 0  ;;  %s3841_s0 = inlined_call_operand.hbm [shape: f32[2,4,16,16], index: 0, kind: input, shape index: {}]   ;;  %s3842_s1 = inlined_call_operand.hbm [shape: bf16[3,64,256], index: 1, kind: input, shape index: {}]   ;;  %s3843_s2 = inlined_call_operand.vmem [shape: f32[1,256], index: 2, kind: input, shape index: {}]   ;;  %s3844_s3 = inlined_call_operand.hbm [shape: bf16[256,128], index: 3, kind: input, shape index: {}]   ;;  %s3845_s4 = inlined_call_operand.hbm [shape: bf16[3,128,256], index: 4, kind: input, shape index: {}]   ;;  %s3846_s5 = inlined_call_operand.vmem [shape: f32[1,256], index: 5, kind: input, shape index: {}]   ;;  %s3847_s6 = inlined_call_operand.hbm [shape: bf16[256,128], index: 6, kind: input, shape index: {}]   ;;  %s3848_s7 = inlined_call_operand.hbm [shape: bf16[512,128], index: 7, kind: input, shape index: {}]   ;;  %s3849_s8 = inlined_call_operand.vmem [shape: f32[1,128], index: 8, kind: input, shape index: {}]   ;;  %s3850_s9 = inlined_call_operand.hbm [shape: bf16[128,128], index: 9, kind: input, shape index: {}]   ;;  %s3851_s10 = inlined_call_operand.vmem [shape: f32[1,128], index: 10, kind: input, shape index: {}]   ;;  %s3852_s11 = inlined_call_operand.hbm [shape: bf16[128,128], index: 11, kind: input, shape index: {}]   ;;  %s3853_s12 = inlined_call_operand.vmem [shape: f32[1,128], index: 12, kind: input, shape index: {}]   ;;  %s3854_s13 = inlined_call_operand.hbm [shape: f32[2,128], index: 13, kind: output, shape index: {}]  }
   0x1   :  { %19 = vsyncpa [#allocation6], 0 }
   0x2   :  { %20 = vsyncpa [#allocation9], 0 }
   0x3   :  { %21 = vsyncpa [#allocation12], 0 }
   0x4   :  { %22 = vsyncpa [#allocation15], 0 }
   0x5   :  { %23 = vsyncpa [#allocation4], 0  ;;  %s3387_s25 = smov [#allocation5]   ;;  %s3388_s27 = smov [#allocation8]  }
   0x6   :  { %s41_s26 = sshll.u32 %s3387_s25, 4  ;;  %s67_s28 = sshll.u32 %s3388_s27, 4  ;;  %s42_s26 = int_to_ptr.vmem [resolvable:$true] %s41_s26  ;;  %s3479_s28 = int_to_ptr.vmem [resolvable:$true] %s67_s28 }
   0x7   :  { %s3177_s14 = scalar_lea.hbm %s3842_s1, 3072 }
   0x8   :  { %p3178_p0 = scmp.ne.s32.totalorder %s3842_s1, %s3177_s14  ;;  %p3181_p1 = scmp.lt.u32.totalorder %s3177_s14, %s3842_s1 }
   0xa   :  { %p3183_p2 = pnand %p3181_p1, %p3178_p0 }
   0xc   :  { %3186 = shalt.err (!%p3183_p2)
}
   0xd   :  { %s3187_s19 = scalar_lea.vmem %s42_s26, 3072  ;;  %p3192_p4 = scmp.lt.s32.totalorder %s42_s26, %s42_s26 }
   0xe   :  { %p3188_p3 = scmp.ne.s32.totalorder %s42_s26, %s3187_s19  ;;  %p3193_p5 = scmp.lt.s32.totalorder %s3187_s19, %s3187_s19 }
  0x10   :  { %p3194_p6 = por %p3193_p5, %p3192_p4 }
  0x12   :  { %p3195_p7 = pnand %p3194_p6, %p3188_p3 }
  0x14   :  { %3198 = shalt.err (!%p3195_p7)
}
  0x15   :  { %s3389_s20 = smov 128   ;;  %s3390_s21 = smov 8  }
  0x16   :  { %47 = dma.hbm_to_vmem [thread:$0]  %s3842_s1, 3072, %s42_s26, [#allocation6], %s3389_s20, %s3389_s20, %s3390_s21  }
  0x17   :  { %s3199_s27 = scalar_lea.hbm %s3845_s4, 6144 }
  0x18   :  { %p3200_p8 = scmp.ne.s32.totalorder %s3845_s4, %s3199_s27  ;;  %p3203_p9 = scmp.lt.u32.totalorder %s3199_s27, %s3845_s4 }
  0x1a   :  { %p3205_p10 = pnand %p3203_p9, %p3200_p8 }
  0x1c   :  { %3208 = shalt.err (!%p3205_p10)
}
  0x1d   :  { %s3209_s16 = scalar_lea.vmem %s3479_s28, 6144  ;;  %p3214_p12 = scmp.lt.s32.totalorder %s3479_s28, %s3479_s28 }
  0x1e   :  { %p3210_p11 = scmp.ne.s32.totalorder %s3479_s28, %s3209_s16  ;;  %p3215_p13 = scmp.lt.s32.totalorder %s3209_s16, %s3209_s16 }
  0x20   :  { %p3216_p0 = por %p3215_p13, %p3214_p12 }
  0x22   :  { %p3217_p1 = pnand %p3216_p0, %p3210_p11 }
  0x24   :  { %3220 = shalt.err (!%p3217_p1)
}
  0x25   :  { %73 = dma.hbm_to_vmem [thread:$0]  %s3845_s4, 6144, %s3479_s28, [#allocation9], %s3389_s20, %s3389_s20, %s3390_s21  }
  0x26   :  { %s3391_s17 = smov [#allocation11]   ;;  %s3392_s19 = smov [#allocation2]  }
  0x27   :  { %s93_s18 = sshll.u32 %s3391_s17, 4  ;;  %s29_s22 = sshll.u32 %s3392_s19, 4  ;;  %s94_s18 = int_to_ptr.vmem [resolvable:$true] %s93_s18  ;;  %s3516_s22 = int_to_ptr.vmem [resolvable:$true] %s29_s22 }
  0x28   :  { %s3221_s25 = scalar_lea.hbm %s3848_s7, 4096 }
  0x29   :  { %p3222_p2 = scmp.ne.s32.totalorder %s3848_s7, %s3221_s25  ;;  %p3225_p3 = scmp.lt.u32.totalorder %s3221_s25, %s3848_s7 }
  0x2b   :  { %p3227_p4 = pnand %p3225_p3, %p3222_p2 }
  0x2d   :  { %3230 = shalt.err (!%p3227_p4)
}
  0x2e   :  { %s3231_s4 = scalar_lea.vmem %s94_s18, 4096  ;;  %p3236_p6 = scmp.lt.s32.totalorder %s94_s18, %s94_s18 }
  0x2f   :  { %p3232_p5 = scmp.ne.s32.totalorder %s94_s18, %s3231_s4  ;;  %p3237_p7 = scmp.lt.s32.totalorder %s3231_s4, %s3231_s4 }
  0x31   :  { %p3238_p8 = por %p3237_p7, %p3236_p6 }
  0x33   :  { %p3239_p9 = pnand %p3238_p8, %p3232_p5 }
  0x35   :  { %3242 = shalt.err (!%p3239_p9)
}
  0x36   :  { %s3393_s28 = smov 64   ;;  %s3394_s15 = smov 4  }
  0x37   :  { %99 = dma.hbm_to_vmem [thread:$0]  %s3848_s7, 4096, %s94_s18, [#allocation12], %s3393_s28, %s3393_s28, %s3394_s15  }
  0x38   :  { %s3243_s19 = scalar_lea.hbm %s3841_s0, 2048 }
  0x39   :  { %p3244_p10 = scmp.ne.s32.totalorder %s3841_s0, %s3243_s19  ;;  %p3247_p11 = scmp.lt.u32.totalorder %s3243_s19, %s3841_s0 }
  0x3b   :  { %p3249_p12 = pnand %p3247_p11, %p3244_p10 }
  0x3d   :  { %3252 = shalt.err (!%p3249_p12)
}
  0x3e   :  { %s3253_s29 = scalar_lea.vmem %s3516_s22, 2048  ;;  %p3258_p0 = scmp.lt.s32.totalorder %s3516_s22, %s3516_s22 }
  0x3f   :  { %p3254_p13 = scmp.ne.s32.totalorder %s3516_s22, %s3253_s29  ;;  %p3259_p1 = scmp.lt.s32.totalorder %s3253_s29, %s3253_s29 }
  0x41   :  { %p3260_p2 = por %p3259_p1, %p3258_p0 }
  0x43   :  { %p3261_p3 = pnand %p3260_p2, %p3254_p13 }
  0x45   :  { %3264 = shalt.err (!%p3261_p3)
}
  0x46   :  { %35 = dma.hbm_to_vmem [thread:$0]  %s3841_s0, 2048, %s3516_s22, [#allocation3], %s3389_s20, %s3389_s20, %s3390_s21  }
  0x47   :  { %s3395_s30 = smov [#allocation7]   ;;  %s3396_s4 = smov [#allocation10]  }
  0x48   :  { %s55_s14 = sshll.u32 %s3395_s30, 4  ;;  %s81_s16 = sshll.u32 %s3396_s4, 4  ;;  %s56_s14 = int_to_ptr.vmem [resolvable:$true] %s55_s14  ;;  %s3553_s16 = int_to_ptr.vmem [resolvable:$true] %s81_s16 }
  0x49   :  { %s3265_s17 = scalar_lea.hbm %s3844_s3, 2048 }
  0x4a   :  { %p3266_p4 = scmp.ne.s32.totalorder %s3844_s3, %s3265_s17  ;;  %p3269_p5 = scmp.lt.u32.totalorder %s3265_s17, %s3844_s3 }
  0x4c   :  { %p3271_p6 = pnand %p3269_p5, %p3266_p4 }
  0x4e   :  { %3274 = shalt.err (!%p3271_p6)
}
  0x4f   :  { %s3275_s0 = scalar_lea.vmem %s56_s14, 2048  ;;  %p3280_p8 = scmp.lt.s32.totalorder %s56_s14, %s56_s14 }
  0x50   :  { %p3276_p7 = scmp.ne.s32.totalorder %s56_s14, %s3275_s0  ;;  %p3281_p9 = scmp.lt.s32.totalorder %s3275_s0, %s3275_s0 }
  0x52   :  { %p3282_p10 = por %p3281_p9, %p3280_p8 }
  0x54   :  { %p3283_p11 = pnand %p3282_p10, %p3276_p7 }
  0x56   :  { %3286 = shalt.err (!%p3283_p11)
}
  0x57   :  { %61 = dma.hbm_to_vmem [thread:$0]  %s3844_s3, 2048, %s56_s14, [#allocation6], %s3393_s28, %s3393_s28, %s3394_s15  }
  0x58   :  { %s3287_s29 = scalar_lea.hbm %s3847_s6, 2048 }
  0x59   :  { %p3288_p12 = scmp.ne.s32.totalorder %s3847_s6, %s3287_s29  ;;  %p3291_p13 = scmp.lt.u32.totalorder %s3287_s29, %s3847_s6 }
  0x5b   :  { %p3293_p0 = pnand %p3291_p13, %p3288_p12 }
  0x5d   :  { %3296 = shalt.err (!%p3293_p0)
}
  0x5e   :  { %s3297_s1 = scalar_lea.vmem %s3553_s16, 2048  ;;  %p3302_p2 = scmp.lt.s32.totalorder %s3553_s16, %s3553_s16 }
  0x5f   :  { %p3298_p1 = scmp.ne.s32.totalorder %s3553_s16, %s3297_s1  ;;  %p3303_p3 = scmp.lt.s32.totalorder %s3297_s1, %s3297_s1 }
  0x61   :  { %p3304_p4 = por %p3303_p3, %p3302_p2 }
  0x63   :  { %p3305_p5 = pnand %p3304_p4, %p3298_p1 }
  0x65   :  { %3308 = shalt.err (!%p3305_p5)
}
  0x66   :  { %87 = dma.hbm_to_vmem [thread:$0]  %s3847_s6, 2048, %s3553_s16, [#allocation9], %s3393_s28, %s3393_s28, %s3394_s15  }
  0x67   :  { %s3397_s26 = smov [#allocation13]   ;;  %s3398_s19 = smov [#allocation14]  }
  0x68   :  { %s107_s17 = sshll.u32 %s3397_s26, 4  ;;  %s121_s23 = sshll.u32 %s3398_s19, 4  ;;  %s108_s17 = int_to_ptr.vmem [resolvable:$true] %s107_s17  ;;  %s3590_s23 = int_to_ptr.vmem [resolvable:$true] %s121_s23 }
  0x69   :  { %s3309_s0 = scalar_lea.hbm %s3850_s9, 1024 }
  0x6a   :  { %p3310_p6 = scmp.ne.s32.totalorder %s3850_s9, %s3309_s0  ;;  %p3313_p7 = scmp.lt.u32.totalorder %s3309_s0, %s3850_s9 }
  0x6c   :  { %p3315_p8 = pnand %p3313_p7, %p3310_p6 }
  0x6e   :  { %3318 = shalt.err (!%p3315_p8)
}
  0x6f   :  { %s3319_s6 = scalar_lea.vmem %s108_s17, 1024  ;;  %p3324_p10 = scmp.lt.s32.totalorder %s108_s17, %s108_s17 }
  0x70   :  { %p3320_p9 = scmp.ne.s32.totalorder %s108_s17, %s3319_s6  ;;  %p3325_p11 = scmp.lt.s32.totalorder %s3319_s6, %s3319_s6 }
  0x72   :  { %p3326_p12 = por %p3325_p11, %p3324_p10 }
  0x74   :  { %p3327_p13 = pnand %p3326_p12, %p3320_p9 }
  0x76   :  { %3330 = shalt.err (!%p3327_p13)
}
  0x77   :  { %113 = dma.hbm_to_vmem [thread:$0]  %s3850_s9, 1024, %s108_s17, [#allocation12], %s3393_s28, %s3393_s28, %s3394_s15  }
  0x78   :  { %s3331_s30 = scalar_lea.hbm %s3852_s11, 1024 }
  0x79   :  { %p3332_p0 = scmp.ne.s32.totalorder %s3852_s11, %s3331_s30  ;;  %p3335_p1 = scmp.lt.u32.totalorder %s3331_s30, %s3852_s11 }
  0x7b   :  { %p3337_p2 = pnand %p3335_p1, %p3332_p0 }
  0x7d   :  { %3340 = shalt.err (!%p3337_p2)
}
  0x7e   :  { %s3341_s26 = scalar_lea.vmem %s3590_s23, 1024  ;;  %p3346_p4 = scmp.lt.s32.totalorder %s3590_s23, %s3590_s23 }
  0x7f   :  { %p3342_p3 = scmp.ne.s32.totalorder %s3590_s23, %s3341_s26  ;;  %p3347_p5 = scmp.lt.s32.totalorder %s3341_s26, %s3341_s26 }
  0x81   :  { %p3348_p6 = por %p3347_p5, %p3346_p4 }
  0x83   :  { %p3349_p7 = pnand %p3348_p6, %p3342_p3 }
  0x85   :  { %3352 = shalt.err (!%p3349_p7)
}
  0x86   :  { %127 = dma.hbm_to_vmem [thread:$0]  %s3852_s11, 1024, %s3590_s23, [#allocation15], %s3393_s28, %s3393_s28, %s3394_s15  }
  0x87   :  { %3375 = dma.done.wait [#allocation3], 2048  }
  0x88   :  { %3376 = vsyncadd [#allocation3], 4294965248 }
  0x89   :  { %3377 = dma.done.wait [#allocation6], 5120  }
  0x8a   :  { %3378 = vsyncadd [#allocation6], 4294962176 }
  0x8b   :  { %3379 = dma.done.wait [#allocation9], 8192  }
  0x8c   :  { %3380 = vsyncadd [#allocation9], 4294959104 }
  0x8d   :  { %3381 = dma.done.wait [#allocation12], 5120  }
  0x8e   :  { %3382 = vsyncadd [#allocation12], 4294962176 }
  0x8f   :  { %3383 = dma.done.wait [#allocation15], 1024  }
  0x90   :  { %3384 = vsyncadd [#allocation15], 4294966272  ;;  %v3399_v0 = vmov 0   ;;  %v160_v1 = vld [vmem:[#allocation2 + $0x10] sm:$0xff]  ;;  %v161_v2 = vld [vmem:[#allocation2 + $0x18] sm:$0xff]  ;;  %s3400_s11 = smov 16  }
  0x91   :  { %365 = vmatprep.mubr.bf16.mxu0 %v3399_v0  ;;  %v170_v3 = vld [vmem:[#allocation2 + $0x30] sm:$0xff]  ;;  %v2929_v4 = vpack.i.bf16 %v161_v2, %v160_v1  ;;  %v171_v5 = vld [vmem:[#allocation2 + $0x38] sm:$0xff]  ;;  %v165_v6 = vld [vmem:[#allocation2 + $0x20] sm:$0xff]  ;;  %s3401_s28 = smov 48   ;;  %s3402_s15 = smov 32   ;;  %vm222_vm0 = vcmask 130048  }
  0x92   :  { %v166_v7 = vld [vmem:[#allocation2 + $0x28] sm:$0xff]  ;;  %v2939_v8 = vpack.i.bf16 %v171_v5, %v170_v3  ;;  %v162_v9 = vld [vmem:[#allocation2 + $0x50] sm:$0xff]  ;;  %v163_v10 = vld [vmem:[#allocation2 + $0x58] sm:$0xff]  ;;  %vm227_vm1 = vcmask 261120   ;;  %vm232_vm2 = vcmask 392192   ;;  %vm328_vm3 = vcmask 523264  }
  0x93   :  { %v167_v11 = vld [vmem:[#allocation2 + $0x60] sm:$0xff]  ;;  %2930 = vrot.lane.b32.xlu0 %v2929_v4, %s3400_s11  ;;  %v2934_v12 = vpack.i.bf16 %v166_v7, %v165_v6  ;;  %v168_v13 = vld [vmem:[#allocation2 + $0x68] sm:$0xff]  ;;  %v172_v14 = vld [vmem:[#allocation2 + $0x70] sm:$0xff]  ;;  %v2944_v16 = vpack.i.bf16 %v163_v10, %v162_v9  ;;  %vm255_vm4 = vcmask 1040384   ;;  %vm256_vm5 = vsmask.f32 256 }
  0x94   :  { %v173_v15 = vld [vmem:[#allocation2 + $0x78] sm:$0xff]  ;;  %2940 = vrot.lane.b32.xlu1 %v2939_v8, %s3401_s28  ;;  %v2989_v17 = vld [vmem:[#allocation5 + $0x44] ss:$8 sps:$4 sm:$0xff]   ;;  %v2991_v18 = vld [vmem:[#allocation5 + $0x40] ss:$8 sps:$4 sm:$0xff]   ;;  %v2949_v20 = vpack.i.bf16 %v168_v13, %v167_v11  ;;  %vm266_vm7 = vcmask 1047552  }
  0x95   :  { %333 = vmatprep.subr.bf16.mxu0 %v2989_v17  ;;  %v2992_v19 = vld [vmem:[#allocation5 + $0x54] ss:$8 sps:$4 sm:$0xff]   ;;  %v2994_v21 = vld [vmem:[#allocation5 + $0x50] ss:$8 sps:$4 sm:$0xff]   ;;  %v2954_v22 = vpack.i.bf16 %v173_v15, %v172_v14  ;;  %v2995_v23 = vld [vmem:[#allocation5 + $0x64] ss:$8 sps:$4 sm:$0xff]  }
  0x96   :  { %334 = vmatpush1.bf16.msra.mxu0 %v2991_v18  ;;  %v2997_v24 = vld [vmem:[#allocation5 + $0x60] ss:$8 sps:$4 sm:$0xff]   ;;  %v2998_v25 = vld [vmem:[#allocation5 + $0x74] ss:$8 sps:$4 sm:$0xff]   ;;  %v3000_v26 = vld [vmem:[#allocation5 + $0x70] ss:$8 sps:$4 sm:$0xff]  }
  0x97   :  { %2935 = vrot.lane.b32.xlu0 %v2934_v12, %s3402_s15  ;;  %335 = vmatprep.subr.bf16.mxu0 %v2992_v19  ;;  %v3003_v27 = vld [vmem:[#allocation5 + $0x4] ss:$8 sps:$4 sm:$0xff]   ;;  %v3001_v51 = vld [vmem:[#allocation5] ss:$8 sps:$4 sm:$0xff]   ;;  %v3006_v58 = vld [vmem:[#allocation5 + $0x14] ss:$8 sps:$4 sm:$0xff]  }
  0x98   :  { %2945 = vrot.lane.b32.xlu1 %v2944_v16, %s3400_s11  ;;  %v155_v32 = vld [vmem:[#allocation2] sm:$0xff]  ;;  %v156_v33 = vld [vmem:[#allocation2 + $0x8] sm:$0xff]  ;;  %v3004_v63 = vld [vmem:[#allocation5 + $0x10] ss:$8 sps:$4 sm:$0xff]   ;;  %vm267_vm8 = vsmask.f32 7424 }
  0x99   :  { %v157_v40 = vld [vmem:[#allocation2 + $0x40] sm:$0xff]  ;;  %v158_v41 = vld [vmem:[#allocation2 + $0x48] sm:$0xff]  ;;  %v3012_v7 = vld [vmem:[#allocation5 + $0x34] ss:$8 sps:$4 sm:$0xff]   ;;  %vm653_vm10 = vcmask 1039360   ;;  %vm1061_vm11 = vcmask 1042434  }
  0x9a   :  { %336 = vmatpush1.bf16.msra.mxu0 %v2994_v21  ;;  %v3009_v1 = vld [vmem:[#allocation5 + $0x24] ss:$8 sps:$4 sm:$0xff]   ;;  %v3007_v5 = vld [vmem:[#allocation5 + $0x20] ss:$8 sps:$4 sm:$0xff]   ;;  %v3010_v10 = vld [vmem:[#allocation5 + $0x30] ss:$8 sps:$4 sm:$0xff]  }
  0x9b   :  { %2950 = vrot.lane.b32.xlu0 %v2949_v20, %s3402_s15  ;;  %337 = vmatprep.subr.bf16.mxu0 %v2995_v23  ;;  %v3015_v11 = vld [vmem:[#allocation5 + $0x84] ss:$8 sps:$4 sm:$0xff]   ;;  %vm3644_vm6 = vmand %vm255_vm4, %vm256_vm5  ;;  %v3013_v15 = vld [vmem:[#allocation5 + $0x80] ss:$8 sps:$4 sm:$0xff]   ;;  %vm1102_vm12 = vcmask 1041409   ;;  %vm1064_vm13 = vcmask 1043459  }
  0x9c   :  { %2955 = vrot.lane.b32.xlu1 %v2954_v22, %s3401_s28  ;;  %v3018_v16 = vld [vmem:[#allocation5 + $0x94] ss:$8 sps:$4 sm:$0xff]   ;;  %v3016_v19 = vld [vmem:[#allocation5 + $0x90] ss:$8 sps:$4 sm:$0xff]   ;;  %v3021_v21 = vld [vmem:[#allocation5 + $0xa4] ss:$8 sps:$4 sm:$0xff]  }
  0x9d   :  { %v3019_v23 = vld [vmem:[#allocation5 + $0xa0] ss:$8 sps:$4 sm:$0xff]   ;;  %vm268_vm9 = vmand %vm266_vm7, %vm267_vm8  ;;  %vm1067_vm14 = vcmask 1044484   ;;  %vm1070_vm15 = vcmask 1045509   ;;  %v3074_v14 = vld [vmem:[#allocation8 + $0x30] ss:$8 sps:$4 sm:$0xff]  }
  0x9e   :  { %338 = vmatpush1.bf16.msra.mxu0 %v2997_v24  ;;  %v3024_v24 = vld [vmem:[#allocation5 + $0xb4] ss:$8 sps:$4 sm:$0xff]   ;;  %vm3407_vm5 = vmmov 0   ;;  %s3408_s27 = smov [#allocation16]  }
  0x9f   :  { %339 = vmatprep.subr.bf16.mxu0 %v2998_v25  ;;  %s2531_s6 = sshll.u32 %s3408_s27, 4  ;;  %s2532_s6 = int_to_ptr.vmem [resolvable:$true] %s2531_s6 }
  0xa0   :  { %p3358_p9 = scmp.lt.s32.totalorder %s2532_s6, %s2532_s6 }
  0xa2   :  { %340 = vmatpush1.bf16.msra.mxu0 %v3000_v26 }
  0xa3   :  { %432 = vmatprep.subr.bf16.mxu0 %v3003_v27  ;;  %v3022_v27 = vld [vmem:[#allocation5 + $0xb0] ss:$8 sps:$4 sm:$0xff]  }
 0x105   :  { %v2931_v28 = vpop.permute.xlu0 %2930 }
 0x106   :  { %v2941_v29 = vpop.permute.xlu1 %2940  ;;  %v2933_v30 = vunpack.i.h.bf16 %v2931_v28  ;;  %v2932_v31 = vunpack.i.l.bf16 %v2931_v28 }
 0x107   :  { %v2943_v34 = vunpack.i.h.bf16 %v2941_v29  ;;  %v2942_v35 = vunpack.i.l.bf16 %v2941_v29 }
 0x108   :  { %v223_v42 = vsel %vm222_vm0, %v155_v32, %v2932_v31  ;;  %v224_v43 = vsel %vm222_vm0, %v156_v33, %v2933_v30  ;;  %v3025_v33 = vld [vmem:[#allocation7 + $0x40] sm:$0xff]  }
 0x109   :  { %v2936_v36 = vpop.permute.xlu0 %2935  ;;  %2731 = vmatprep.subr.bf16.mxu1 %v3025_v33 }
 0x10a   :  { %v2938_v37 = vunpack.i.h.bf16 %v2936_v36  ;;  %v2937_v38 = vunpack.i.l.bf16 %v2936_v36  ;;  %v2946_v39 = vpop.permute.xlu1 %2945  ;;  %v3028_v36 = vld [vmem:[#allocation7 + $0x8] sm:$0xff]  }
 0x10b   :  { %v2948_v44 = vunpack.i.h.bf16 %v2946_v39  ;;  %v2947_v45 = vunpack.i.l.bf16 %v2946_v39  ;;  %v3031_v39 = vld [vmem:[#allocation7 + $0x58] sm:$0xff]  }
 0x10c   :  { %v228_v46 = vsel %vm227_vm1, %v223_v42, %v2937_v38  ;;  %v229_v47 = vsel %vm227_vm1, %v224_v43, %v2938_v37  ;;  %v3029_v37 = vld [vmem:[#allocation7 + $0x50] sm:$0xff]   ;;  %v3034_v42 = vld [vmem:[#allocation7 + $0x20] sm:$0xff]   ;;  %v3035_v43 = vld [vmem:[#allocation7 + $0x68] sm:$0xff]  }
 0x10d   :  { %v225_v48 = vsel %vm222_vm0, %v157_v40, %v2947_v45  ;;  %v226_v49 = vsel %vm222_vm0, %v158_v41, %v2948_v44  ;;  %v2951_v50 = vpop.permute.xlu0 %2950  ;;  %v233_v52 = vsel %vm232_vm2, %v228_v46, %v2942_v35  ;;  %v234_v53 = vsel %vm232_vm2, %v229_v47, %v2943_v34  ;;  %v3026_v34 = vld [vmem:[#allocation7] sm:$0xff]   ;;  %v3027_v35 = vld [vmem:[#allocation7 + $0x48] sm:$0xff]   ;;  %v3030_v38 = vld [vmem:[#allocation7 + $0x10] sm:$0xff]  }
 0x10e   :  { %v2953_v54 = vunpack.i.h.bf16 %v2951_v50  ;;  %v2952_v55 = vunpack.i.l.bf16 %v2951_v50  ;;  %v2956_v56 = vpop.permute.xlu1 %2955  ;;  %v237_v57 = vpack.c.bf16 %v234_v53, %v233_v52  ;;  %2732 = vmatpush3.bf16.msra.mxu1 %v3026_v34  ;;  %v3032_v40 = vld [vmem:[#allocation7 + $0x18] sm:$0xff]   ;;  %v3033_v41 = vld [vmem:[#allocation7 + $0x60] sm:$0xff]   ;;  %v3036_v44 = vld [vmem:[#allocation7 + $0x28] sm:$0xff]   ;;  %v603_v45 = vlaneseq }
 0x10f   :  { %v2958_v59 = vunpack.i.h.bf16 %v2956_v56  ;;  %v2957_v60 = vunpack.i.l.bf16 %v2956_v56  ;;  %2733 = vmatprep.subr.bf16.mxu1 %v3027_v35  ;;  %v3037_v50 = vld [vmem:[#allocation7 + $0x70] sm:$0xff]   ;;  %vm1073_vm0 = vcmask 1046534  }
 0x110   :  { %v230_v61 = vsel %vm227_vm1, %v225_v48, %v2952_v55  ;;  %v231_v62 = vsel %vm227_vm1, %v226_v49, %v2953_v54  ;;  %2552 = vmatmul.mubr.msk.bf16.vlgmr.msra.gmra.mrb[0].mxu0 %vm328_vm3, %v237_v57  ;;  %v240_v4 = vshrl.u32 %v237_v57, 16  ;;  %v243_v9 = vshll.u32 %v237_v57, 16  ;;  %v601_v48 = vld [vmem:[%s3843_s2] sm:$0x3]  ;;  %v3039_v54 = vld [vmem:[#allocation7 + $0x78] sm:$0xff]   ;;  %s3403_s2 = smov 127  }
 0x111   :  { %433 = vmatpush1.bf16.msra.mxu0 %v3001_v51  ;;  %375 = vmatprep.mubr.bf16.mxu0 %v3399_v0  ;;  %v235_v2 = vsel %vm232_vm2, %v230_v61, %v2957_v60  ;;  %v236_v3 = vsel %vm232_vm2, %v231_v62, %v2958_v59  ;;  %v3659_v46 = vshrl.u32 %v603_v45, 7  ;;  %v3038_v51 = vld [vmem:[#allocation7 + $0x30] sm:$0xff]   ;;  %v3040_v55 = vld [vmem:[#allocation7 + $0x38] sm:$0xff]   ;;  %vm1076_vm1 = vcmask 1047559  }
 0x112   :  { %434 = vmatprep.subr.bf16.mxu0 %v3006_v58  ;;  %v238_v6 = vpack.c.bf16 %v236_v3, %v235_v2  ;;  %v242_v8 = vrot.slane %v240_v4, 7  ;;  %v260_v26 = vrot.slane %v243_v9, 1  ;;  %2734 = vmatpush3.bf16.msra.mxu1 %v3028_v36  ;;  %vm1130_vm2 = vcmask 1043456  }
 0x113   :  { %2735 = vmatprep.subr.bf16.mxu1 %v3029_v37  ;;  %v605_v47 = vsub.s32 0, %v3659_v46  ;;  %v609_v49 = vsub.s32 1, %v3659_v46 }
 0x114   :  { %v245_v12 = vor.u32 %v243_v9, %v242_v8  ;;  %v247_v13 = vshrl.u32 %v238_v6, 16  ;;  %v250_v20 = vshll.u32 %v238_v6, 16  ;;  %v261_v28 = vor.u32 %v260_v26, %v240_v4 }
 0x115   :  { %435 = vmatpush1.bf16.msra.mxu0 %v3004_v63  ;;  %v606_v52 = vrot.slane %v601_v48, %v605_v47  ;;  %v610_v53 = vrot.slane %v601_v48, %v609_v49 }
 0x116   :  { %436 = vmatprep.subr.bf16.mxu0 %v3009_v1  ;;  %v258_v17 = vsel %vm3644_vm6, 0, %v245_v12  ;;  %v249_v18 = vrot.slane %v247_v13, 7  ;;  %v269_v29 = vsel %vm268_vm9, %v261_v28, 0  ;;  %v262_v30 = vrot.slane %v250_v20, 1  ;;  %2736 = vmatpush3.bf16.msra.mxu1 %v3030_v38 }
 0x117   :  { %2737 = vmatprep.subr.bf16.mxu1 %v3031_v39 }
 0x118   :  { %2553 = vmatmul.mubr.msk.bf16.gmra.mrb[4].mxu0 %vm328_vm3, %v238_v6  ;;  %v252_v22 = vor.u32 %v250_v20, %v249_v18  ;;  %v263_v31 = vor.u32 %v262_v30, %v247_v13 }
 0x119   :  { %437 = vmatpush1.bf16.msra.mxu0 %v3007_v5  ;;  %464 = vmatprep.mubr.bf16.mxu0 %v3399_v0 }
 0x11a   :  { %438 = vmatprep.subr.bf16.mxu0 %v3012_v7  ;;  %v259_v25 = vsel %vm3644_vm6, 0, %v252_v22  ;;  %v270_v32 = vsel %vm268_vm9, %v263_v31, 0  ;;  %2738 = vmatpush3.bf16.msra.mxu1 %v3032_v40 }
 0x11b   :  { %2739 = vmatprep.subr.bf16.mxu1 %v3033_v41 }
 0x11d   :  { %439 = vmatpush1.bf16.msra.mxu0 %v3010_v10 }
 0x11e   :  { %540 = vmatprep.subr.bf16.mxu0 %v3015_v11  ;;  %2740 = vmatpush3.bf16.msra.mxu1 %v3034_v42 }
 0x11f   :  { %2741 = vmatprep.subr.bf16.mxu1 %v3035_v43 }
 0x120   :  { %2562 = vmatmul.mubr.msk.bf16.vlgmr.msra.gmra.mrb[0].mxu0 %vm328_vm3, %v258_v17 }
 0x121   :  { %541 = vmatpush1.bf16.msra.mxu0 %v3013_v15  ;;  %474 = vmatprep.mubr.bf16.mxu0 %v3399_v0 }
 0x122   :  { %542 = vmatprep.subr.bf16.mxu0 %v3018_v16  ;;  %2742 = vmatpush3.bf16.msra.mxu1 %v3036_v44 }
 0x123   :  { %2743 = vmatprep.subr.bf16.mxu1 %v3037_v50 }
 0x125   :  { %543 = vmatpush1.bf16.msra.mxu0 %v3016_v19 }
 0x126   :  { %544 = vmatprep.subr.bf16.mxu0 %v3021_v21  ;;  %2744 = vmatpush3.bf16.msra.mxu1 %v3038_v51 }
 0x127   :  { %2745 = vmatprep.subr.bf16.mxu1 %v3039_v54 }
 0x128   :  { %2563 = vmatmul.mubr.msk.bf16.gmra.mrb[4].mxu0 %vm328_vm3, %v259_v25 }
 0x129   :  { %545 = vmatpush1.bf16.msra.mxu0 %v3019_v23  ;;  %572 = vmatprep.mubr.bf16.mxu0 %v3399_v0 }
 0x12a   :  { %546 = vmatprep.subr.bf16.mxu0 %v3024_v24  ;;  %2746 = vmatpush3.bf16.msra.mxu1 %v3040_v55 }
 0x12d   :  { %547 = vmatpush1.bf16.msra.mxu0 %v3022_v27 }
 0x130   :  { %2572 = vmatmul.mubr.msk.bf16.vlgmr.msra.gmra.mrb[0].mxu0 %vm328_vm3, %v269_v29 }
 0x131   :  { %582 = vmatprep.mubr.bf16.mxu0 %v3399_v0 }
 0x138   :  { %2573 = vmatmul.mubr.msk.bf16.gmra.mrb[4].mxu0 %vm328_vm3, %v270_v32  ;;  %vm1131_vm3 = vsmask.f32 3328 }
 0x139   :  { %vm1132_vm4 = vmand %vm1130_vm2, %vm1131_vm3 }
 0x203   :  { %v574_v56 = vpop.f32.mrb[0].mxu0 }
 0x204   :  { %v613_v57 = vadd.f32 %v606_v52, %v574_v56  ;;  %v576_v58 = vpop.f32.mrb[1].mxu0 }
 0x205   :  { %v614_v59 = vadd.f32 %v610_v53, %v576_v58  ;;  %v578_v60 = vpop.f32.mrb[2].mxu0  ;;  %v3041_v58 = vld [vmem:[#allocation8 + $0x80] ss:$8 sps:$4 sm:$0xff]  }
 0x206   :  { %v621_v61 = vmax.f32 %v613_v57, 0.0  ;;  %v615_v62 = vadd.f32 %v606_v52, %v578_v60  ;;  %v580_v63 = vpop.f32.mrb[3].mxu0  ;;  %v3043_v57 = vld [vmem:[#allocation8 + $0x84] ss:$8 sps:$4 sm:$0xff]   ;;  %v3044_v60 = vld [vmem:[#allocation8 + $0x90] ss:$8 sps:$4 sm:$0xff]  }
 0x207   :  { %v622_v1 = vmax.f32 %v614_v59, 0.0  ;;  %v616_v2 = vadd.f32 %v610_v53, %v580_v63  ;;  %1278 = vmatprep.subr.bf16.mxu1 %v3043_v57  ;;  %v3046_v59 = vld [vmem:[#allocation8 + $0x94] ss:$8 sps:$4 sm:$0xff]  }
 0x208   :  { %v623_v3 = vmax.f32 %v615_v62, 0.0  ;;  %v3047_v62 = vld [vmem:[#allocation8 + $0xa0] ss:$8 sps:$4 sm:$0xff]   ;;  %v3052_v63 = vld [vmem:[#allocation8 + $0xb4] ss:$8 sps:$4 sm:$0xff]  }
 0x209   :  { %v2959_v4 = vpack.i.bf16 %v622_v1, %v621_v61  ;;  %v624_v5 = vmax.f32 %v616_v2, 0.0  ;;  %v3055_v2 = vld [vmem:[#allocation8 + $0xc4] ss:$8 sps:$4 sm:$0xff]  }
 0x20b   :  { %v2964_v6 = vpack.i.bf16 %v624_v5, %v623_v3  ;;  %2960 = vrot.lane.b32.xlu0 %v2959_v4, %s3403_s2  ;;  %v584_v7 = vpop.f32.mrb[4].mxu0  ;;  %v3058_v4 = vld [vmem:[#allocation8 + $0xd4] ss:$8 sps:$4 sm:$0xff]  }
 0x20c   :  { %v617_v8 = vadd.f32 %v606_v52, %v584_v7  ;;  %v586_v9 = vpop.f32.mrb[5].mxu0  ;;  %v3059_v7 = vld [vmem:[#allocation8 + $0xe0] ss:$8 sps:$4 sm:$0xff]  }
 0x20d   :  { %v618_v10 = vadd.f32 %v610_v53, %v586_v9  ;;  %2965 = vrot.lane.b32.xlu1 %v2964_v6, %s3403_s2  ;;  %v588_v11 = vpop.f32.mrb[6].mxu0  ;;  %v3061_v6 = vld [vmem:[#allocation8 + $0xe4] ss:$8 sps:$4 sm:$0xff]   ;;  %v3062_v9 = vld [vmem:[#allocation8 + $0xf0] ss:$8 sps:$4 sm:$0xff]  }
 0x20e   :  { %v625_v12 = vmax.f32 %v617_v8, 0.0  ;;  %v619_v13 = vadd.f32 %v606_v52, %v588_v11  ;;  %v590_v15 = vpop.f32.mrb[7].mxu0  ;;  %v3064_v8 = vld [vmem:[#allocation8 + $0xf4] ss:$8 sps:$4 sm:$0xff]   ;;  %v3404_v11 = vmov 1983009808  }
 0x20f   :  { %v626_v16 = vmax.f32 %v618_v10, 0.0  ;;  %v620_v17 = vadd.f32 %v610_v53, %v590_v15  ;;  %v3067_v10 = vld [vmem:[#allocation8 + $0x4] ss:$8 sps:$4 sm:$0xff]  }
 0x210   :  { %v627_v18 = vmax.f32 %v619_v13, 0.0 }
 0x211   :  { %v2969_v19 = vpack.i.bf16 %v626_v16, %v625_v12  ;;  %v628_v20 = vmax.f32 %v620_v17, 0.0 }
 0x213   :  { %v2974_v21 = vpack.i.bf16 %v628_v20, %v627_v18  ;;  %2970 = vrot.lane.b32.xlu0 %v2969_v19, %s3403_s2 }
 0x215   :  { %2975 = vrot.lane.b32.xlu1 %v2974_v21, %s3403_s2 }
 0x27d   :  { %v2961_v22 = vpop.permute.xlu0 %2960 }
 0x27e   :  { %v2963_v23 = vunpack.i.h.bf16 %v2961_v22  ;;  %v2962_v24 = vunpack.i.l.bf16 %v2961_v22 }
 0x27f   :  { %v2966_v25 = vpop.permute.xlu1 %2965 }
 0x280   :  { %v654_v26 = vsel %vm653_vm10, %v2962_v24, %v2963_v23  ;;  %v2968_v27 = vunpack.i.h.bf16 %v2966_v25  ;;  %v2967_v28 = vunpack.i.l.bf16 %v2966_v25  ;;  %v670_v29 = vsel %vm653_vm10, %v2963_v23, %v2962_v24 }
 0x281   :  { %v675_v32 = vmax.f32 %v622_v1, %v670_v29  ;;  %v674_v34 = vmax.f32 %v621_v61, %v654_v26  ;;  %v3049_v61 = vld [vmem:[#allocation8 + $0xa4] ss:$8 sps:$4 sm:$0xff]   ;;  %v3050_v1 = vld [vmem:[#allocation8 + $0xb0] ss:$8 sps:$4 sm:$0xff]  }
 0x282   :  { %v655_v30 = vsel %vm653_vm10, %v2967_v28, %v2968_v27  ;;  %v671_v31 = vsel %vm653_vm10, %v2968_v27, %v2967_v28 }
 0x283   :  { %v677_v33 = vmax.f32 %v624_v5, %v671_v31  ;;  %v676_v35 = vmax.f32 %v623_v3, %v655_v30  ;;  %v3053_v3 = vld [vmem:[#allocation8 + $0xc0] ss:$8 sps:$4 sm:$0xff]   ;;  %v3056_v5 = vld [vmem:[#allocation8 + $0xd0] ss:$8 sps:$4 sm:$0xff]  }
 0x285   :  { %v2971_v36 = vpop.permute.xlu0 %2970  ;;  %v683_v37 = vpack.c.bf16 %v677_v33, %v675_v32  ;;  %v682_v38 = vpack.c.bf16 %v676_v35, %v674_v34 }
 0x286   :  { %v2973_v39 = vunpack.i.h.bf16 %v2971_v36  ;;  %v2972_v40 = vunpack.i.l.bf16 %v2971_v36 }
 0x287   :  { %846 = vmatprep.mubr.bf16.mxu1 %v683_v37  ;;  %v2976_v41 = vpop.permute.xlu1 %2975 }
 0x288   :  { %v656_v42 = vsel %vm653_vm10, %v2972_v40, %v2973_v39  ;;  %v672_v43 = vsel %vm653_vm10, %v2973_v39, %v2972_v40  ;;  %v2978_v44 = vunpack.i.h.bf16 %v2976_v41  ;;  %v2977_v45 = vunpack.i.l.bf16 %v2976_v41  ;;  %847 = vmatmul.mubr.bf16.vlgmr.msra.gmra.mrb[0].mxu1 %v682_v38 }
 0x289   :  { %v679_v51 = vmax.f32 %v626_v16, %v672_v43  ;;  %v678_v53 = vmax.f32 %v625_v12, %v656_v42  ;;  %1279 = vmatpush1.bf16.msra.mxu1 %v3041_v58  ;;  %v869_v12 = vunpack.c.l.s4 %v3404_v11 }
 0x28a   :  { %v657_v48 = vsel %vm653_vm10, %v2977_v45, %v2978_v44  ;;  %v673_v50 = vsel %vm653_vm10, %v2978_v44, %v2977_v45  ;;  %1280 = vmatprep.subr.bf16.mxu1 %v3046_v59 }
 0x28b   :  { %v681_v52 = vmax.f32 %v628_v20, %v673_v50  ;;  %v680_v54 = vmax.f32 %v627_v18, %v657_v48  ;;  %v870_v13 = vunpack.c.0.s8 %v869_v12 }
 0x28d   :  { %v685_v55 = vpack.c.bf16 %v681_v52, %v679_v51  ;;  %v684_v56 = vpack.c.bf16 %v680_v54, %v678_v53  ;;  %1281 = vmatpush1.bf16.msra.mxu1 %v3044_v60  ;;  %v3684_v15 = vsub.s32 %v870_v13, %v3659_v46 }
 0x28e   :  { %1282 = vmatprep.subr.bf16.mxu1 %v3049_v61 }
 0x28f   :  { %854 = vmatprep.mubr.bf16.mxu1 %v685_v55 }
 0x290   :  { %855 = vmatmul.mubr.bf16.gmra.mrb[4].mxu1 %v684_v56 }
 0x291   :  { %1310 = vmatprep.mubr.bf16.mxu1 %v3399_v0  ;;  %1283 = vmatpush1.bf16.msra.mxu1 %v3047_v62 }
 0x292   :  { %1284 = vmatprep.subr.bf16.mxu1 %v3052_v63 }
 0x295   :  { %1285 = vmatpush1.bf16.msra.mxu1 %v3050_v1 }
 0x296   :  { %1286 = vmatprep.subr.bf16.mxu1 %v3055_v2 }
 0x299   :  { %1287 = vmatpush1.bf16.msra.mxu1 %v3053_v3 }
 0x29a   :  { %1288 = vmatprep.subr.bf16.mxu1 %v3058_v4 }
 0x29d   :  { %1289 = vmatpush1.bf16.msra.mxu1 %v3056_v5 }
 0x29e   :  { %1290 = vmatprep.subr.bf16.mxu1 %v3061_v6 }
 0x2a1   :  { %1291 = vmatpush1.bf16.msra.mxu1 %v3059_v7 }
 0x2a2   :  { %1292 = vmatprep.subr.bf16.mxu1 %v3064_v8 }
 0x2a5   :  { %1293 = vmatpush1.bf16.msra.mxu1 %v3062_v9 }
 0x2a6   :  { %1407 = vmatprep.subr.bf16.mxu1 %v3067_v10 }
 0x35b   :  { %v2747_v16 = vpop.f32.mrb[0].mxu1 }
 0x35c   :  { %v2748_v17 = vpop.f32.mrb[1].mxu1 }
 0x35d   :  { %v2749_v18 = vadd.f32 %v2748_v17, %v2747_v16  ;;  %v2750_v19 = vpop.f32.mrb[2].mxu1 }
 0x35e   :  { %v2751_v20 = vpop.f32.mrb[3].mxu1 }
 0x35f   :  { %v867_v21 = vcombine.high %v2749_v18, %v2749_v18  ;;  %v874_v22 = vrot.slane %v2749_v18, %v3684_v15  ;;  %v2752_v23 = vadd.f32 %v2751_v20, %v2750_v19 }
 0x361   :  { %v881_v24 = vrot.slane %v867_v21, %v3684_v15  ;;  %v882_v25 = vcombine.high %v874_v22, %v874_v22  ;;  %v2590_v26 = vrot.slane %v874_v22, 9  ;;  %v884_v27 = vcombine.high %v2752_v23, %v2752_v23 }
 0x362   :  { %v891_v28 = vrot.slane %v2752_v23, %v3684_v15 }
 0x363   :  { %v883_v29 = vcombine.high %v881_v24, %v881_v24  ;;  %v2591_v30 = vrot.slane %v882_v25, 9  ;;  %v2592_v31 = vrot.slane %v881_v24, 9  ;;  %v999_v32 = vmax.f32 %v874_v22, %v2590_v26  ;;  %v3689_v33 = vpop.f32.mrb[4].mxu1 }
 0x364   :  { %v898_v34 = vrot.slane %v884_v27, %v3684_v15  ;;  %v899_v35 = vcombine.high %v891_v28, %v891_v28  ;;  %v2594_v36 = vrot.slane %v891_v28, 9  ;;  %v3692_v37 = vpop.f32.mrb[5].mxu1 }
 0x365   :  { %v2593_v38 = vrot.slane %v883_v29, 9  ;;  %v1000_v39 = vmax.f32 %v882_v25, %v2591_v30  ;;  %v1001_v40 = vmax.f32 %v881_v24, %v2592_v31  ;;  %v1015_v41 = vpack.c.bf16 %v999_v32, %v999_v32  ;;  %v2756_v42 = vpop.f32.mrb[6].mxu1 }
 0x366   :  { %v900_v43 = vcombine.high %v898_v34, %v898_v34  ;;  %v2595_v44 = vrot.slane %v899_v35, 9  ;;  %v2596_v45 = vrot.slane %v898_v34, 9  ;;  %v1003_v48 = vmax.f32 %v891_v28, %v2594_v36  ;;  %v2757_v50 = vpop.f32.mrb[7].mxu1 }
 0x367   :  { %v1002_v51 = vmax.f32 %v883_v29, %v2593_v38  ;;  %v1016_v52 = vpack.c.bf16 %v1000_v39, %v1000_v39  ;;  %v1017_v53 = vpack.c.bf16 %v1001_v40, %v1001_v40  ;;  %v1045_v54 = vunpack.c.l.b16 %v1015_v41 }
 0x368   :  { %v2597_v55 = vrot.slane %v900_v43, 9  ;;  %v1004_v56 = vmax.f32 %v899_v35, %v2595_v44  ;;  %v1005_v57 = vmax.f32 %v898_v34, %v2596_v45  ;;  %v1019_v58 = vpack.c.bf16 %v1003_v48, %v1003_v48 }
 0x369   :  { %v1018_v59 = vpack.c.bf16 %v1002_v51, %v1002_v51  ;;  %v1046_v60 = vunpack.c.l.b16 %v1016_v52  ;;  %v1047_v61 = vunpack.c.l.b16 %v1017_v53  ;;  %v1059_v62 = vrot.slane %v1045_v54, 7 }
 0x36a   :  { %v1006_v63 = vmax.f32 %v900_v43, %v2597_v55  ;;  %v1020_v1 = vpack.c.bf16 %v1004_v56, %v1004_v56  ;;  %v1021_v2 = vpack.c.bf16 %v1005_v57, %v1005_v57  ;;  %v1049_v6 = vunpack.c.l.b16 %v1019_v58 }
 0x36b   :  { %v1048_v3 = vunpack.c.l.b16 %v1018_v59  ;;  %v1060_v4 = vrot.slane %v1046_v60, 6  ;;  %v1101_v5 = vrot.slane %v1047_v61, 7  ;;  %v1063_v7 = vrot.slane %v1047_v61, 5 }
 0x36c   :  { %v1168_v8 = vrot.slane %v1046_v60, 7  ;;  %v1170_v9 = vrot.slane %v1047_v61, 6  ;;  %v1022_v10 = vpack.c.bf16 %v1006_v63, %v1006_v63  ;;  %v1050_v16 = vunpack.c.l.b16 %v1020_v1 }
 0x36d   :  { %v1062_v11 = vsel %vm1061_vm11, %v1060_v4, %v1059_v62  ;;  %v1103_v12 = vsel %vm1102_vm12, %v1101_v5, %v1046_v60  ;;  %v1104_v13 = vrot.slane %v1048_v3, 6  ;;  %v1172_v18 = vrot.slane %v1048_v3, 5 }
 0x36e   :  { %v1169_v17 = vsel %vm1102_vm12, %v1168_v8, %v1045_v54  ;;  %v1051_v19 = vunpack.c.l.b16 %v1021_v2  ;;  %v1066_v20 = vrot.slane %v1048_v3, 4  ;;  %v1065_v23 = vsel %vm1064_vm13, %v1063_v7, %v1062_v11 }
 0x36f   :  { %v1105_v21 = vsel %vm1061_vm11, %v1104_v13, %v1103_v12  ;;  %v1171_v22 = vsel %vm1061_vm11, %v1170_v9, %v1169_v17  ;;  %v1069_v25 = vrot.slane %v1049_v6, 3  ;;  %v1106_v26 = vrot.slane %v1049_v6, 5 }
 0x370   :  { %v1173_v24 = vsel %vm1064_vm13, %v1172_v18, %v1171_v22  ;;  %v1072_v27 = vrot.slane %v1050_v16, 2  ;;  %v1075_v28 = vrot.slane %v1051_v19, 1  ;;  %v3701_v29 = vunpack.c.l.b16 %v1022_v10 }
 0x371   :  { %v1174_v30 = vrot.slane %v1049_v6, 4  ;;  %v1107_v31 = vsel %vm1064_vm13, %v1106_v26, %v1105_v21  ;;  %v1108_v32 = vrot.slane %v1050_v16, 4  ;;  %v1110_v34 = vrot.slane %v1051_v19, 3 }
 0x372   :  { %v1176_v35 = vrot.slane %v1050_v16, 3  ;;  %v2755_v38 = vadd.f32 %v3692_v37, %v3689_v33  ;;  %v2758_v39 = vadd.f32 %v2757_v50, %v2756_v42  ;;  %v1068_v40 = vsel %vm1067_vm14, %v1066_v20, %v1065_v23 }
 0x373   :  { %v1175_v36 = vsel %vm1067_vm14, %v1174_v30, %v1173_v24  ;;  %v1178_v41 = vrot.slane %v1051_v19, 2  ;;  %v1071_v44 = vsel %vm1070_vm15, %v1069_v25, %v1068_v40  ;;  %v1109_v45 = vsel %vm1067_vm14, %v1108_v32, %v1107_v31 }
 0x374   :  { %v1177_v43 = vsel %vm1070_vm15, %v1176_v35, %v1175_v36  ;;  %v901_v48 = vcombine.high %v2755_v38, %v2755_v38  ;;  %v908_v51 = vrot.slane %v2755_v38, %v3684_v15  ;;  %v918_v52 = vcombine.high %v2758_v39, %v2758_v39 }
 0x375   :  { %v925_v53 = vrot.slane %v2758_v39, %v3684_v15  ;;  %v1180_v54 = vrot.slane %v3701_v29, 1  ;;  %v1179_v33 = vsel %vm1073_vm0, %v1178_v41, %v1177_v43  ;;  %v1074_v37 = vsel %vm1073_vm0, %v1072_v27, %v1071_v44 }
 0x376   :  { %v3717_v42 = vsel %vm1070_vm15, %v1110_v34, %v1109_v45  ;;  %v915_v50 = vrot.slane %v901_v48, %v3684_v15  ;;  %v916_v55 = vcombine.high %v908_v51, %v908_v51  ;;  %v2598_v56 = vrot.slane %v908_v51, 9 }
 0x377   :  { %v932_v57 = vrot.slane %v918_v52, %v3684_v15  ;;  %v933_v58 = vcombine.high %v925_v53, %v925_v53  ;;  %v2602_v59 = vrot.slane %v925_v53, 9  ;;  %v3722_v60 = vsel %vm1076_vm1, %v1180_v54, %v1179_v33 }
 0x378   :  { %v3725_v61 = vsel %vm1076_vm1, %v1075_v28, %v1074_v37  ;;  %v917_v62 = vcombine.high %v915_v50, %v915_v50  ;;  %v2599_v63 = vrot.slane %v916_v55, 9  ;;  %v2600_v1 = vrot.slane %v915_v50, 9 }
 0x379   :  { %v1007_v2 = vmax.f32 %v908_v51, %v2598_v56  ;;  %v934_v3 = vcombine.high %v932_v57, %v932_v57  ;;  %v2603_v4 = vrot.slane %v933_v58, 9  ;;  %v2604_v5 = vrot.slane %v932_v57, 9 }
 0x37a   :  { %v1011_v6 = vmax.f32 %v925_v53, %v2602_v59  ;;  %v2601_v7 = vrot.slane %v917_v62, 9  ;;  %v1008_v8 = vmax.f32 %v916_v55, %v2599_v63  ;;  %v1009_v9 = vmax.f32 %v915_v50, %v2600_v1 }
 0x37b   :  { %v1023_v10 = vpack.c.bf16 %v1007_v2, %v1007_v2  ;;  %v2605_v11 = vrot.slane %v934_v3, 9  ;;  %v1012_v12 = vmax.f32 %v933_v58, %v2603_v4  ;;  %v1013_v13 = vmax.f32 %v932_v57, %v2604_v5 }
 0x37c   :  { %v1027_v16 = vpack.c.bf16 %v1011_v6, %v1011_v6  ;;  %v1010_v17 = vmax.f32 %v917_v62, %v2601_v7  ;;  %v1024_v18 = vpack.c.bf16 %v1008_v8, %v1008_v8  ;;  %v1025_v19 = vpack.c.bf16 %v1009_v9, %v1009_v9 }
 0x37d   :  { %v1052_v20 = vunpack.c.l.b16 %v1023_v10  ;;  %v1014_v21 = vmax.f32 %v934_v3, %v2605_v11  ;;  %v1028_v22 = vpack.c.bf16 %v1012_v12, %v1012_v12  ;;  %v1029_v23 = vpack.c.bf16 %v1013_v13, %v1013_v13 }
 0x37e   :  { %v1056_v24 = vunpack.c.l.b16 %v1027_v16  ;;  %v1112_v25 = vrot.slane %v3701_v29, 2  ;;  %v1026_v26 = vpack.c.bf16 %v1010_v17, %v1010_v17  ;;  %v1053_v27 = vunpack.c.l.b16 %v1024_v18  ;;  %v3065_v18 = vld [vmem:[#allocation8] ss:$8 sps:$4 sm:$0xff]  }
 0x37f   :  { %v1054_v28 = vunpack.c.l.b16 %v1025_v19  ;;  %v1078_v30 = vrot.slane %v1052_v20, 7  ;;  %v1030_v31 = vpack.c.bf16 %v1014_v21, %v1014_v21  ;;  %v1057_v32 = vunpack.c.l.b16 %v1028_v22  ;;  %v3070_v21 = vld [vmem:[#allocation8 + $0x14] ss:$8 sps:$4 sm:$0xff]  }
 0x380   :  { %v1058_v34 = vunpack.c.l.b16 %v1029_v23  ;;  %v1055_v35 = vunpack.c.l.b16 %v1026_v26  ;;  %v1079_v36 = vrot.slane %v1053_v27, 6  ;;  %v1182_v40 = vrot.slane %v1053_v27, 7 }
 0x381   :  { %v1081_v38 = vrot.slane %v1054_v28, 5  ;;  %v1114_v39 = vrot.slane %v1054_v28, 7  ;;  %v1184_v41 = vrot.slane %v1054_v28, 6  ;;  %v1085_v43 = vrot.slane %v1056_v24, 3  ;;  %v3068_v28 = vld [vmem:[#allocation8 + $0x10] ss:$8 sps:$4 sm:$0xff]  }
 0x382   :  { %v1087_v44 = vrot.slane %v1057_v32, 2  ;;  %v1080_v45 = vsel %vm1061_vm11, %v1079_v36, %v1078_v30  ;;  %v1116_v48 = vrot.slane %v1055_v35, 6  ;;  %v1089_v51 = vrot.slane %v1058_v34, 1  ;;  %v3077_v36 = vld [vmem:[#allocation8 + $0x40] ss:$8 sps:$4 sm:$0xff]  }
 0x383   :  { %v1115_v29 = vsel %vm1102_vm12, %v1114_v39, %v1053_v27  ;;  %v1083_v52 = vrot.slane %v1055_v35, 4  ;;  %v1183_v53 = vsel %vm1102_vm12, %v1182_v40, %v1052_v20  ;;  %v1186_v54 = vrot.slane %v1055_v35, 5  ;;  %v3079_v35 = vld [vmem:[#allocation8 + $0x44] ss:$8 sps:$4 sm:$0xff]   ;;  %v3080_v39 = vld [vmem:[#allocation8 + $0x50] ss:$8 sps:$4 sm:$0xff]  }
 0x384   :  { %v1100_v33 = vunpack.c.l.b16 %v1030_v31  ;;  %v1082_v37 = vsel %vm1064_vm13, %v1081_v38, %v1080_v45  ;;  %v1117_v50 = vsel %vm1061_vm11, %v1116_v48, %v1115_v29  ;;  %v1185_v55 = vsel %vm1061_vm11, %v1184_v41, %v1183_v53  ;;  %v3073_v31 = vld [vmem:[#allocation8 + $0x24] ss:$8 sps:$4 sm:$0xff]   ;;  %v3082_v38 = vld [vmem:[#allocation8 + $0x54] ss:$8 sps:$4 sm:$0xff]   ;;  %v3083_v41 = vld [vmem:[#allocation8 + $0x60] ss:$8 sps:$4 sm:$0xff]  }
 0x385   :  { %v1118_v56 = vrot.slane %v1056_v24, 5  ;;  %v1187_v57 = vsel %vm1064_vm13, %v1186_v54, %v1185_v55  ;;  %v1120_v58 = vrot.slane %v1057_v32, 4  ;;  %v1122_v59 = vrot.slane %v1058_v34, 3  ;;  %v3085_v40 = vld [vmem:[#allocation8 + $0x64] ss:$8 sps:$4 sm:$0xff]  }
 0x386   :  { %v1188_v62 = vrot.slane %v1056_v24, 4  ;;  %v1124_v1 = vrot.slane %v1100_v33, 2  ;;  %v1190_v2 = vrot.slane %v1057_v32, 3  ;;  %v1192_v3 = vrot.slane %v1058_v34, 2  ;;  %v3071_v32 = vld [vmem:[#allocation8 + $0x20] ss:$8 sps:$4 sm:$0xff]  }
 0x387   :  { %v1119_v63 = vsel %vm1064_vm13, %v1118_v56, %v1117_v50  ;;  %v1194_v5 = vrot.slane %v1100_v33, 1  ;;  %v1084_v6 = vsel %vm1067_vm14, %v1083_v52, %v1082_v37  ;;  %v1113_v7 = vsel %vm1073_vm0, %v1112_v25, %v3717_v42  ;;  %v3076_v34 = vld [vmem:[#allocation8 + $0x34] ss:$8 sps:$4 sm:$0xff]   ;;  %v3091_v45 = vld [vmem:[#allocation8 + $0x104] ss:$8 sps:$4 sm:$0xff]  }
 0x388   :  { %v1189_v4 = vsel %vm1067_vm14, %v1188_v62, %v1187_v57  ;;  %v1086_v9 = vsel %vm1070_vm15, %v1085_v43, %v1084_v6  ;;  %v1091_v10 = vpack.c.b16 %v3725_v61, %v3725_v61  ;;  %v1121_v11 = vsel %vm1067_vm14, %v1120_v58, %v1119_v63  ;;  %v3088_v43 = vld [vmem:[#allocation8 + $0x74] ss:$8 sps:$4 sm:$0xff]   ;;  %v3089_v29 = vld [vmem:[#allocation8 + $0x100] ss:$8 sps:$4 sm:$0xff]   ;;  %v3097_v52 = vld [vmem:[#allocation8 + $0x124] ss:$8 sps:$4 sm:$0xff]  }
 0x389   :  { %v1191_v8 = vsel %vm1070_vm15, %v1190_v2, %v1189_v4  ;;  %v1088_v13 = vsel %vm1073_vm0, %v1087_v44, %v1086_v9  ;;  %v1123_v16 = vsel %vm1070_vm15, %v1122_v59, %v1121_v11  ;;  %v1126_v17 = vpack.c.b16 %v1113_v7, %v1113_v7  ;;  %v3086_v44 = vld [vmem:[#allocation8 + $0x70] ss:$8 sps:$4 sm:$0xff]   ;;  %v3094_v48 = vld [vmem:[#allocation8 + $0x114] ss:$8 sps:$4 sm:$0xff]   ;;  %v3095_v53 = vld [vmem:[#allocation8 + $0x120] ss:$8 sps:$4 sm:$0xff]  }
 0x38a   :  { %v1193_v12 = vsel %vm1073_vm0, %v1192_v3, %v1191_v8  ;;  %v1090_v42 = vsel %vm1076_vm1, %v1089_v51, %v1088_v13  ;;  %v1125_v20 = vsel %vm1073_vm0, %v1124_v1, %v1123_v16  ;;  %v1095_v24 = vsel %vm3644_vm6, 0, %v1091_v10  ;;  %v3092_v51 = vld [vmem:[#allocation8 + $0x110] ss:$8 sps:$4 sm:$0xff]   ;;  %v3100_v54 = vld [vmem:[#allocation8 + $0x134] ss:$8 sps:$4 sm:$0xff]   ;;  %v3113_v62 = vld [vmem:[#allocation10 + $0x40] sm:$0xff]  }
 0x38b   :  { %v1195_v19 = vsel %vm1076_vm1, %v1194_v5, %v1193_v12  ;;  %v1092_v22 = vpack.c.b16 %v1090_v42, %v1090_v42  ;;  %v1127_v23 = vpack.c.b16 %v1125_v20, %v1125_v20  ;;  %v3758_v26 = vsel %vm1132_vm4, %v1126_v17, 0  ;;  %v3098_v33 = vld [vmem:[#allocation8 + $0x130] ss:$8 sps:$4 sm:$0xff]   ;;  %v3103_v37 = vld [vmem:[#allocation8 + $0x144] ss:$8 sps:$4 sm:$0xff]   ;;  %2759 = vmatprep.subr.bf16.mxu0 %v3113_v62 }
 0x38c   :  { %v1196_v61 = vpack.c.b16 %v1195_v19, %v3722_v60  ;;  %v3101_v50 = vld [vmem:[#allocation8 + $0x140] ss:$8 sps:$4 sm:$0xff]   ;;  %v3106_v55 = vld [vmem:[#allocation8 + $0x154] ss:$8 sps:$4 sm:$0xff]   ;;  %v3104_v56 = vld [vmem:[#allocation8 + $0x150] ss:$8 sps:$4 sm:$0xff]  }
 0x38d   :  { %v1096_v25 = vsel %vm3644_vm6, 0, %v1092_v22  ;;  %v3760_v27 = vsel %vm1132_vm4, %v1127_v23, 0  ;;  %v3109_v57 = vld [vmem:[#allocation8 + $0x164] ss:$8 sps:$4 sm:$0xff]   ;;  %v3112_v58 = vld [vmem:[#allocation8 + $0x174] ss:$8 sps:$4 sm:$0xff]  }
 0x38e   :  { %1311 = vmatmul.mubr.bf16.vlgmr.msra.gmra.mrb[8].mxu1 %v1196_v61  ;;  %v2622_v30 = vcombine.low %v1095_v24, %v1096_v25  ;;  %v2639_v60 = vcombine.low %v3758_v26, %v3760_v27  ;;  %v3110_v59 = vld [vmem:[#allocation8 + $0x170] ss:$8 sps:$4 sm:$0xff]   ;;  %v3114_v63 = vld [vmem:[#allocation10] sm:$0xff]   ;;  %v3115_v1 = vld [vmem:[#allocation10 + $0x48] sm:$0xff]  }
 0x38f   :  { %1408 = vmatpush1.bf16.msra.mxu1 %v3065_v18  ;;  %1439 = vmatprep.mubr.bf16.mxu1 %v3399_v0  ;;  %v3116_v2 = vld [vmem:[#allocation10 + $0x8] sm:$0xff]   ;;  %v3117_v3 = vld [vmem:[#allocation10 + $0x50] sm:$0xff]   ;;  %v3119_v5 = vld [vmem:[#allocation10 + $0x58] sm:$0xff]  }
 0x390   :  { %1409 = vmatprep.subr.bf16.mxu1 %v3070_v21  ;;  %2760 = vmatpush3.bf16.msra.mxu0 %v3114_v63  ;;  %v3118_v4 = vld [vmem:[#allocation10 + $0x10] sm:$0xff]   ;;  %v3120_v6 = vld [vmem:[#allocation10 + $0x18] sm:$0xff]   ;;  %v3121_v7 = vld [vmem:[#allocation10 + $0x60] sm:$0xff]  }
 0x391   :  { %2761 = vmatprep.subr.bf16.mxu0 %v3115_v1  ;;  %v3122_v8 = vld [vmem:[#allocation10 + $0x20] sm:$0xff]   ;;  %v3123_v9 = vld [vmem:[#allocation10 + $0x68] sm:$0xff]   ;;  %v3125_v16 = vld [vmem:[#allocation10 + $0x70] sm:$0xff]   ;;  %v3405_v1 = vmov 0.0  }
 0x392   :  { %v3124_v10 = vld [vmem:[#allocation10 + $0x28] sm:$0xff]   ;;  %v1600_v11 = vld [vmem:[%s3846_s5] sm:$0x3]  ;;  %v3126_v18 = vld [vmem:[#allocation10 + $0x30] sm:$0xff]  }
 0x393   :  { %1410 = vmatpush1.bf16.msra.mxu1 %v3068_v28  ;;  %v1605_v12 = vrot.slane %v1600_v11, %v605_v47  ;;  %v1609_v13 = vrot.slane %v1600_v11, %v609_v49  ;;  %v3127_v21 = vld [vmem:[#allocation10 + $0x78] sm:$0xff]   ;;  %v3129_v28 = vld [vmem:[#allocation11 + $0x40] sm:$0xff]   ;;  %v3142_v62 = vld [vmem:[#allocation11 + $0x30] sm:$0xff]  }
 0x394   :  { %1411 = vmatprep.subr.bf16.mxu1 %v3073_v31  ;;  %2762 = vmatpush3.bf16.msra.mxu0 %v3116_v2  ;;  %v3128_v22 = vld [vmem:[#allocation10 + $0x38] sm:$0xff]  }
 0x395   :  { %2763 = vmatprep.subr.bf16.mxu0 %v3117_v3  ;;  %v3143_v63 = vld [vmem:[#allocation11 + $0x78] sm:$0xff]   ;;  %v3145_v3 = vld [vmem:[#allocation11 + $0xc0] sm:$0xff]  }
 0x396   :  { %v3144_v2 = vld [vmem:[#allocation11 + $0x38] sm:$0xff]  }
 0x397   :  { %1412 = vmatpush1.bf16.msra.mxu1 %v3071_v32 }
 0x398   :  { %1413 = vmatprep.subr.bf16.mxu1 %v3076_v34  ;;  %2764 = vmatpush3.bf16.msra.mxu0 %v3118_v4 }
 0x399   :  { %2765 = vmatprep.subr.bf16.mxu0 %v3119_v5 }
 0x39b   :  { %1414 = vmatpush1.bf16.msra.mxu1 %v3074_v14 }
 0x39c   :  { %1415 = vmatprep.subr.bf16.mxu1 %v3079_v35  ;;  %2766 = vmatpush3.bf16.msra.mxu0 %v3120_v6 }
 0x39d   :  { %2767 = vmatprep.subr.bf16.mxu0 %v3121_v7 }
 0x39f   :  { %1416 = vmatpush1.bf16.msra.mxu1 %v3077_v36 }
 0x3a0   :  { %1417 = vmatprep.subr.bf16.mxu1 %v3082_v38  ;;  %2768 = vmatpush3.bf16.msra.mxu0 %v3122_v8 }
 0x3a1   :  { %2769 = vmatprep.subr.bf16.mxu0 %v3123_v9 }
 0x3a3   :  { %1418 = vmatpush1.bf16.msra.mxu1 %v3080_v39 }
 0x3a4   :  { %1419 = vmatprep.subr.bf16.mxu1 %v3085_v40  ;;  %2770 = vmatpush3.bf16.msra.mxu0 %v3124_v10 }
 0x3a5   :  { %2771 = vmatprep.subr.bf16.mxu0 %v3125_v16 }
 0x3a7   :  { %1420 = vmatpush1.bf16.msra.mxu1 %v3083_v41 }
 0x3a8   :  { %1421 = vmatprep.subr.bf16.mxu1 %v3088_v43  ;;  %2772 = vmatpush3.bf16.msra.mxu0 %v3126_v18 }
 0x3a9   :  { %2773 = vmatprep.subr.bf16.mxu0 %v3127_v21 }
 0x3ab   :  { %1422 = vmatpush1.bf16.msra.mxu1 %v3086_v44 }
 0x3ac   :  { %1553 = vmatprep.subr.bf16.mxu1 %v3091_v45  ;;  %2774 = vmatpush3.bf16.msra.mxu0 %v3128_v22 }
 0x3ad   :  { %2781 = vmatprep.subr.bf16.mxu0 %v3129_v28 }
 0x3ae   :  { %1440 = vmatmul.mubr.bf16.vlgmr.msra.gmra.mrb[8].mxu1 %v2622_v30 }
 0x3af   :  { %1554 = vmatpush1.bf16.msra.mxu1 %v3089_v29  ;;  %1585 = vmatprep.mubr.bf16.mxu1 %v3399_v0  ;;  %v3107_v0 = vld [vmem:[#allocation8 + $0x160] ss:$8 sps:$4 sm:$0xff]  }
 0x3b0   :  { %1555 = vmatprep.subr.bf16.mxu1 %v3094_v48 }
 0x3b3   :  { %1556 = vmatpush1.bf16.msra.mxu1 %v3092_v51 }
 0x3b4   :  { %1557 = vmatprep.subr.bf16.mxu1 %v3097_v52  ;;  %v3130_v52 = vld [vmem:[#allocation11] sm:$0xff]  }
 0x3b7   :  { %1558 = vmatpush1.bf16.msra.mxu1 %v3095_v53  ;;  %v3131_v53 = vld [vmem:[#allocation11 + $0x48] sm:$0xff]  }
 0x3b8   :  { %1559 = vmatprep.subr.bf16.mxu1 %v3100_v54  ;;  %v3132_v54 = vld [vmem:[#allocation11 + $0x8] sm:$0xff]  }
 0x3bb   :  { %1560 = vmatpush1.bf16.msra.mxu1 %v3098_v33  ;;  %v3133_v33 = vld [vmem:[#allocation11 + $0x50] sm:$0xff]  }
 0x3bc   :  { %1561 = vmatprep.subr.bf16.mxu1 %v3103_v37  ;;  %v3134_v37 = vld [vmem:[#allocation11 + $0x10] sm:$0xff]  }
 0x3bf   :  { %1562 = vmatpush1.bf16.msra.mxu1 %v3101_v50  ;;  %v3135_v50 = vld [vmem:[#allocation11 + $0x58] sm:$0xff]  }
 0x3c0   :  { %1563 = vmatprep.subr.bf16.mxu1 %v3106_v55  ;;  %v3136_v55 = vld [vmem:[#allocation11 + $0x18] sm:$0xff]  }
 0x3c3   :  { %1564 = vmatpush1.bf16.msra.mxu1 %v3104_v56  ;;  %v3137_v56 = vld [vmem:[#allocation11 + $0x60] sm:$0xff]  }
 0x3c4   :  { %1565 = vmatprep.subr.bf16.mxu1 %v3109_v57  ;;  %v3138_v57 = vld [vmem:[#allocation11 + $0x20] sm:$0xff]  }
 0x3c7   :  { %1566 = vmatpush1.bf16.msra.mxu1 %v3107_v0  ;;  %v3139_v0 = vld [vmem:[#allocation11 + $0x68] sm:$0xff]  }
 0x3c8   :  { %1567 = vmatprep.subr.bf16.mxu1 %v3112_v58  ;;  %v3140_v58 = vld [vmem:[#allocation11 + $0x28] sm:$0xff]  }
 0x3cb   :  { %1568 = vmatpush1.bf16.msra.mxu1 %v3110_v59  ;;  %v3141_v59 = vld [vmem:[#allocation11 + $0x70] sm:$0xff]  }
 0x3cc   :  { %2843 = vmatprep.subr.bf16.mxu1 %v3405_v1 }
 0x3ce   :  { %1586 = vmatmul.mubr.bf16.vlgmr.msra.gmra.mrb[8].mxu1 %v2639_v60 }
 0x3cf   :  { %2859 = vmatprep.mubr.msk.bf16.mxu1 %vm3407_vm5, %v3405_v1 }
 0x4a1   :  { %v1587_v17 = vpop.f32.mrb[8].mxu1 }
 0x4a2   :  { %v1612_v19 = vadd.f32 %v1605_v12, %v1587_v17  ;;  %v1589_v42 = vpop.f32.mrb[9].mxu1 }
 0x4a3   :  { %v1613_v20 = vadd.f32 %v1609_v13, %v1589_v42  ;;  %v1591_v61 = vpop.f32.mrb[10].mxu1 }
 0x4a4   :  { %v1616_v23 = vmax.f32 %v1612_v19, 0.0  ;;  %v1614_v24 = vadd.f32 %v1605_v12, %v1591_v61  ;;  %v1593_v25 = vpop.f32.mrb[11].mxu1 }
 0x4a5   :  { %v1617_v26 = vmax.f32 %v1613_v20, 0.0  ;;  %v1615_v27 = vadd.f32 %v1609_v13, %v1593_v25 }
 0x4a6   :  { %v1618_v47 = vmax.f32 %v1614_v24, 0.0  ;;  %v3406_v24 = vmov 1934713408  }
 0x4a7   :  { %v2979_v49 = vpack.i.bf16 %v1617_v26, %v1616_v23  ;;  %v1619_v30 = vmax.f32 %v1615_v27, 0.0  ;;  %v1935_v25 = vunpack.c.l.s4 %v3406_v24  ;;  %v3163_v24 = vld [vmem:[#allocation13 + $0x10] sm:$0xff]  }
 0x4a9   :  { %v2984_v60 = vpack.i.bf16 %v1619_v30, %v1618_v47  ;;  %2980 = vrot.lane.b32.xlu0 %v2979_v49, %s3403_s2 }
 0x4ab   :  { %2985 = vrot.lane.b32.xlu1 %v2984_v60, %s3403_s2 }
 0x51b   :  { %v2981_v31 = vpop.permute.xlu0 %2980 }
 0x51c   :  { %v2983_v32 = vunpack.i.h.bf16 %v2981_v31  ;;  %v2982_v34 = vunpack.i.l.bf16 %v2981_v31 }
 0x51d   :  { %v2986_v14 = vpop.permute.xlu1 %2985 }
 0x51e   :  { %v1632_v35 = vsel %vm653_vm10, %v2982_v34, %v2983_v32  ;;  %v1640_v36 = vsel %vm653_vm10, %v2983_v32, %v2982_v34  ;;  %v2988_v38 = vunpack.i.h.bf16 %v2986_v14  ;;  %v2987_v39 = vunpack.i.l.bf16 %v2986_v14 }
 0x51f   :  { %v1642_v43 = vmax.f32 %v1616_v23, %v1632_v35  ;;  %v1643_v45 = vmax.f32 %v1617_v26, %v1640_v36 }
 0x520   :  { %v1633_v40 = vsel %vm653_vm10, %v2987_v39, %v2988_v38  ;;  %v1641_v41 = vsel %vm653_vm10, %v2988_v38, %v2987_v39 }
 0x521   :  { %v1644_v44 = vmax.f32 %v1618_v47, %v1633_v40  ;;  %v1645_v29 = vmax.f32 %v1619_v30, %v1641_v41 }
 0x523   :  { %v1646_v48 = vpack.c.bf16 %v1644_v44, %v1642_v43  ;;  %v1647_v51 = vpack.c.bf16 %v1645_v29, %v1643_v45 }
 0x525   :  { %1808 = vmatprep.mubr.bf16.mxu0 %v1647_v51 }
 0x526   :  { %1809 = vmatmul.mubr.bf16.vlgmr.msra.gmra.mrb[8].mxu0 %v1646_v48 }
 0x527   :  { %2782 = vmatpush3.bf16.msra.mxu0 %v3130_v52 }
 0x528   :  { %2783 = vmatprep.subr.bf16.mxu0 %v3131_v53 }
 0x52b   :  { %2784 = vmatpush3.bf16.msra.mxu0 %v3132_v54 }
 0x52c   :  { %2785 = vmatprep.subr.bf16.mxu0 %v3133_v33 }
 0x52f   :  { %2786 = vmatpush3.bf16.msra.mxu0 %v3134_v37 }
 0x530   :  { %2787 = vmatprep.subr.bf16.mxu0 %v3135_v50 }
 0x533   :  { %2788 = vmatpush3.bf16.msra.mxu0 %v3136_v55 }
 0x534   :  { %2789 = vmatprep.subr.bf16.mxu0 %v3137_v56 }
 0x537   :  { %2790 = vmatpush3.bf16.msra.mxu0 %v3138_v57 }
 0x538   :  { %2791 = vmatprep.subr.bf16.mxu0 %v3139_v0 }
 0x53b   :  { %2792 = vmatpush3.bf16.msra.mxu0 %v3140_v58 }
 0x53c   :  { %2793 = vmatprep.subr.bf16.mxu0 %v3141_v59 }
 0x53f   :  { %2794 = vmatpush3.bf16.msra.mxu0 %v3142_v62 }
 0x540   :  { %2795 = vmatprep.subr.bf16.mxu0 %v3143_v63 }
 0x543   :  { %2796 = vmatpush3.bf16.msra.mxu0 %v3144_v2 }
 0x544   :  { %2803 = vmatprep.subr.bf16.mxu0 %v3145_v3  ;;  %v3146_v3 = vld [vmem:[#allocation11 + $0x80] sm:$0xff]  }
 0x5f9   :  { %v2775_v4 = vpop.f32.mrb[8].mxu0 }
 0x5fa   :  { %v2776_v5 = vpop.f32.mrb[9].mxu0 }
 0x5fb   :  { %v2777_v6 = vadd.f32 %v2776_v5, %v2775_v4  ;;  %v2778_v7 = vpop.f32.mrb[10].mxu0 }
 0x5fc   :  { %v2779_v8 = vpop.f32.mrb[11].mxu0 }
 0x5fd   :  { %v1819_v9 = vcombine.high %v2777_v6, %v2777_v6  ;;  %v1826_v10 = vrot.slane %v2777_v6, %v3684_v15  ;;  %v2780_v11 = vadd.f32 %v2779_v8, %v2778_v7  ;;  %v3147_v6 = vld [vmem:[#allocation11 + $0xc8] sm:$0xff]  }
 0x5fe   :  { %v3148_v8 = vld [vmem:[#allocation11 + $0x88] sm:$0xff]  }
 0x5ff   :  { %v1833_v12 = vrot.slane %v1819_v9, %v3684_v15  ;;  %v1834_v13 = vcombine.high %v1826_v10, %v1826_v10  ;;  %v1836_v16 = vcombine.high %v2780_v11, %v2780_v11  ;;  %v1843_v17 = vrot.slane %v2780_v11, %v3684_v15  ;;  %v3149_v9 = vld [vmem:[#allocation11 + $0xd0] sm:$0xff]   ;;  %v3151_v11 = vld [vmem:[#allocation11 + $0xd8] sm:$0xff]  }
 0x600   :  { %v2672_v19 = vrot.slane %v1826_v10, 9 }
 0x601   :  { %v1835_v18 = vcombine.high %v1833_v12, %v1833_v12  ;;  %v2673_v42 = vrot.slane %v1834_v13, 9  ;;  %v1850_v20 = vrot.slane %v1836_v16, %v3684_v15  ;;  %v1851_v61 = vcombine.high %v1843_v17, %v1843_v17  ;;  %v3154_v16 = vld [vmem:[#allocation11 + $0xa0] sm:$0xff]  }
 0x602   :  { %v2674_v21 = vrot.slane %v1833_v12, 9  ;;  %v2676_v27 = vrot.slane %v1843_v17, 9  ;;  %v1885_v28 = vmax.f32 %v1826_v10, %v2672_v19  ;;  %v1936_v15 = vunpack.c.0.s8 %v1935_v25  ;;  %v3150_v10 = vld [vmem:[#allocation11 + $0x90] sm:$0xff]   ;;  %v3164_v25 = vld [vmem:[#allocation13 + $0x18] sm:$0xff]  }
 0x603   :  { %v2675_v22 = vrot.slane %v1835_v18, 9  ;;  %v1886_v23 = vmax.f32 %v1834_v13, %v2673_v42  ;;  %v1852_v26 = vcombine.high %v1850_v20, %v1850_v20  ;;  %v2677_v47 = vrot.slane %v1851_v61, 9  ;;  %v3153_v13 = vld [vmem:[#allocation11 + $0xe0] sm:$0xff]   ;;  %v3157_v19 = vld [vmem:[#allocation11 + $0xf0] sm:$0xff]  }
 0x604   :  { %v2678_v60 = vrot.slane %v1850_v20, 9  ;;  %v1887_v34 = vmax.f32 %v1833_v12, %v2674_v21  ;;  %v1889_v38 = vmax.f32 %v1843_v17, %v2676_v27  ;;  %v1939_v54 = vsub.s32 %v1936_v15, %v3659_v46  ;;  %v3152_v12 = vld [vmem:[#allocation11 + $0x98] sm:$0xff]   ;;  %v3155_v17 = vld [vmem:[#allocation11 + $0xe8] sm:$0xff]   ;;  %v3158_v42 = vld [vmem:[#allocation11 + $0xb0] sm:$0xff]  }
 0x605   :  { %v1888_v49 = vmax.f32 %v1835_v18, %v2675_v22  ;;  %v1903_v30 = vrot.slane %v1886_v23, 7  ;;  %v2679_v31 = vrot.slane %v1852_v26, 9  ;;  %v1890_v32 = vmax.f32 %v1851_v61, %v2677_v47  ;;  %v3156_v18 = vld [vmem:[#allocation11 + $0xa8] sm:$0xff]   ;;  %v3160_v61 = vld [vmem:[#allocation11 + $0xb8] sm:$0xff]   ;;  %v3161_v22 = vld [vmem:[#allocation13] sm:$0xff]  }
 0x606   :  { %v1891_v43 = vmax.f32 %v1850_v20, %v2678_v60  ;;  %v3159_v20 = vld [vmem:[#allocation11 + $0xf8] sm:$0xff]   ;;  %2844 = vmatpush3.bf16.msra.mxu1 %v3161_v22  ;;  %v3162_v23 = vld [vmem:[#allocation13 + $0x8] sm:$0xff]   ;;  %v3167_v47 = vld [vmem:[#allocation13 + $0x30] sm:$0xff]  }
 0x607   :  { %v1904_v14 = vsel %vm1102_vm12, %v1903_v30, %v1885_v28  ;;  %v1910_v35 = vrot.slane %v1888_v49, 7  ;;  %v1892_v39 = vmax.f32 %v1852_v26, %v2679_v31  ;;  %v1917_v40 = vrot.slane %v1890_v32, 7  ;;  %2845 = vmatprep.subr.bf16.mxu1 %v3405_v1  ;;  %v3165_v26 = vld [vmem:[#allocation13 + $0x20] sm:$0xff]   ;;  %v3166_v27 = vld [vmem:[#allocation13 + $0x28] sm:$0xff]   ;;  %v3168_v28 = vld [vmem:[#allocation13 + $0x38] sm:$0xff]  }
 0x608   :  { %v1905_v36 = vsel %vm1064_vm13, %v1903_v30, %v1904_v14  ;;  %v3169_v49 = vld [vmem:[#allocation14] sm:$0xff]   ;;  %v3171_v60 = vld [vmem:[#allocation14 + $0x10] sm:$0xff]   ;;  %v3172_v31 = vld [vmem:[#allocation14 + $0x18] sm:$0xff]  }
 0x609   :  { %v1911_v41 = vsel %vm1102_vm12, %v1910_v35, %v1887_v34  ;;  %v1918_v44 = vsel %vm1102_vm12, %v1917_v40, %v1889_v38  ;;  %v1924_v45 = vrot.slane %v1892_v39, 7  ;;  %v1906_v29 = vsel %vm1070_vm15, %v1903_v30, %v1905_v36  ;;  %v3173_v32 = vld [vmem:[#allocation14 + $0x20] sm:$0xff]   ;;  %v3174_v34 = vld [vmem:[#allocation14 + $0x28] sm:$0xff]  }
 0x60a   :  { %v1912_v48 = vsel %vm1064_vm13, %v1910_v35, %v1911_v41  ;;  %v1919_v51 = vsel %vm1064_vm13, %v1917_v40, %v1918_v44  ;;  %v1907_v37 = vsel %vm1076_vm1, %v1903_v30, %v1906_v29  ;;  %2846 = vmatpush3.bf16.msra.mxu1 %v3162_v23  ;;  %v3170_v30 = vld [vmem:[#allocation14 + $0x8] sm:$0xff]   ;;  %v2680_v39 = vld [vmem:[%s3849_s8] ss:$0 sm:$0xff] }
 0x60b   :  { %v1925_v52 = vsel %vm1102_vm12, %v1924_v45, %v1891_v43  ;;  %v1920_v53 = vsel %vm1070_vm15, %v1917_v40, %v1919_v51  ;;  %v1913_v33 = vsel %vm1070_vm15, %v1910_v35, %v1912_v48  ;;  %2847 = vmatprep.subr.bf16.mxu1 %v3405_v1 }
 0x60c   :  { %v1921_v50 = vsel %vm1076_vm1, %v1917_v40, %v1920_v53  ;;  %v1926_v55 = vsel %vm1064_vm13, %v1924_v45, %v1925_v52  ;;  %v1914_v0 = vsel %vm1076_vm1, %v1910_v35, %v1913_v33  ;;  %v3175_v53 = vld [vmem:[#allocation14 + $0x30] sm:$0xff]   ;;  %v2713_v33 = vld [vmem:[%s3851_s10] ss:$0 sm:$0xff]  ;;  %s3353_s10 = scalar_lea.vmem %s2532_s6, 32 }
 0x60d   :  { %v1933_v56 = vcombine.low %v1907_v37, %v1921_v50  ;;  %v1927_v57 = vsel %vm1070_vm15, %v1924_v45, %v1926_v55  ;;  %p3354_p8 = scmp.ne.s32.totalorder %s2532_s6, %s3353_s10  ;;  %p3359_p10 = scmp.lt.s32.totalorder %s3353_s10, %s3353_s10 }
 0x60e   :  { %v1928_v58 = vsel %vm1076_vm1, %v1924_v45, %v1927_v57  ;;  %2848 = vmatpush3.bf16.msra.mxu1 %v3163_v24 }
 0x60f   :  { %v1940_v59 = vrot.slane %v1933_v56, %v1939_v54  ;;  %v1942_v62 = vcombine.low %v1914_v0, %v1928_v58  ;;  %2849 = vmatprep.subr.bf16.mxu1 %v3405_v1  ;;  %p3360_p11 = por %p3359_p10, %p3358_p9 }
 0x611   :  { %v1941_v63 = vcombine.high %v1940_v59, %v3405_v1  ;;  %v1949_v46 = vrot.slane %v1942_v62, %v1939_v54  ;;  %v1951_v5 = vpack.c.bf16 %v1940_v59, %v1940_v59  ;;  %v3176_v54 = vld [vmem:[#allocation14 + $0x38] sm:$0xff]   ;;  %v2722_v59 = vld [vmem:[%s3853_s12] ss:$0 sm:$0xff]  ;;  %p3361_p12 = pnand %p3360_p11, %p3354_p8 }
 0x612   :  { %2850 = vmatpush3.bf16.msra.mxu1 %v3164_v25 }
 0x613   :  { %v1952_v2 = vpack.c.bf16 %v1941_v63, %v1941_v63  ;;  %v1950_v4 = vcombine.high %v1949_v46, %v3405_v1  ;;  %v1953_v21 = vpack.c.bf16 %v1949_v46, %v1949_v46  ;;  %2851 = vmatprep.subr.bf16.mxu1 %v3405_v1 }
 0x615   :  { %2250 = vmatprep.mubr.bf16.mxu0 %v1952_v2  ;;  %v1954_v7 = vpack.c.bf16 %v1950_v4, %v1950_v4 }
 0x616   :  { %2251 = vmatmul.mubr.bf16.vlgmr.msra.gmra.mrb[12].mxu0 %v1951_v5  ;;  %2852 = vmatpush3.bf16.msra.mxu1 %v3165_v26 }
 0x617   :  { %2804 = vmatpush3.bf16.msra.mxu0 %v3146_v3  ;;  %2290 = vmatprep.mubr.bf16.mxu0 %v1954_v7 }
 0x618   :  { %2805 = vmatprep.subr.bf16.mxu0 %v3147_v6  ;;  %2853 = vmatprep.subr.bf16.mxu1 %v3405_v1 }
 0x61a   :  { %2854 = vmatpush3.bf16.msra.mxu1 %v3166_v27 }
 0x61b   :  { %2806 = vmatpush3.bf16.msra.mxu0 %v3148_v8  ;;  %2855 = vmatprep.subr.bf16.mxu1 %v3405_v1 }
 0x61c   :  { %2807 = vmatprep.subr.bf16.mxu0 %v3149_v9 }
 0x61e   :  { %2856 = vmatpush3.bf16.msra.mxu1 %v3167_v47 }
 0x61f   :  { %2808 = vmatpush3.bf16.msra.mxu0 %v3150_v10  ;;  %2857 = vmatprep.subr.bf16.mxu1 %v3405_v1 }
 0x620   :  { %2809 = vmatprep.subr.bf16.mxu0 %v3151_v11 }
 0x622   :  { %2858 = vmatpush3.bf16.msra.mxu1 %v3168_v28 }
 0x623   :  { %2810 = vmatpush3.bf16.msra.mxu0 %v3152_v12 }
 0x624   :  { %2811 = vmatprep.subr.bf16.mxu0 %v3153_v13 }
 0x627   :  { %2812 = vmatpush3.bf16.msra.mxu0 %v3154_v16 }
 0x628   :  { %2813 = vmatprep.subr.bf16.mxu0 %v3155_v17 }
 0x62b   :  { %2814 = vmatpush3.bf16.msra.mxu0 %v3156_v18 }
 0x62c   :  { %2815 = vmatprep.subr.bf16.mxu0 %v3157_v19 }
 0x62f   :  { %2816 = vmatpush3.bf16.msra.mxu0 %v3158_v42 }
 0x630   :  { %2817 = vmatprep.subr.bf16.mxu0 %v3159_v20 }
 0x633   :  { %2818 = vmatpush3.bf16.msra.mxu0 %v3160_v61 }
 0x634   :  { %2863 = vmatprep.subr.bf16.mxu0 %v3405_v1 }
 0x636   :  { %2291 = vmatmul.mubr.bf16.vlgmr.msra.gmra.mrb[16].mxu0 %v1953_v21 }
 0x637   :  { %2879 = vmatprep.mubr.msk.bf16.mxu0 %vm3407_vm5, %v3405_v1  ;;  %2864 = vmatpush3.bf16.msra.mxu0 %v3169_v49 }
 0x638   :  { %2865 = vmatprep.subr.bf16.mxu0 %v3405_v1 }
 0x63b   :  { %2866 = vmatpush3.bf16.msra.mxu0 %v3170_v30 }
 0x63c   :  { %2867 = vmatprep.subr.bf16.mxu0 %v3405_v1 }
 0x63f   :  { %2868 = vmatpush3.bf16.msra.mxu0 %v3171_v60 }
 0x640   :  { %2869 = vmatprep.subr.bf16.mxu0 %v3405_v1 }
 0x643   :  { %2870 = vmatpush3.bf16.msra.mxu0 %v3172_v31 }
 0x644   :  { %2871 = vmatprep.subr.bf16.mxu0 %v3405_v1 }
 0x647   :  { %2872 = vmatpush3.bf16.msra.mxu0 %v3173_v32 }
 0x648   :  { %2873 = vmatprep.subr.bf16.mxu0 %v3405_v1 }
 0x64b   :  { %2874 = vmatpush3.bf16.msra.mxu0 %v3174_v34 }
 0x64c   :  { %2875 = vmatprep.subr.bf16.mxu0 %v3405_v1 }
 0x64f   :  { %2876 = vmatpush3.bf16.msra.mxu0 %v3175_v53 }
 0x650   :  { %2877 = vmatprep.subr.bf16.mxu0 %v3405_v1 }
 0x653   :  { %2878 = vmatpush3.bf16.msra.mxu0 %v3176_v54 }
 0x6e9   :  { %v2797_v14 = vpop.f32.mrb[12].mxu0 }
 0x6ea   :  { %v2798_v35 = vpop.f32.mrb[13].mxu0 }
 0x6eb   :  { %v2799_v15 = vadd.f32 %v2798_v35, %v2797_v14  ;;  %v2800_v36 = vpop.f32.mrb[14].mxu0 }
 0x6ec   :  { %v2801_v38 = vpop.f32.mrb[15].mxu0 }
 0x6ed   :  { %v2253_v43 = vadd.f32 %v2799_v15, %v2680_v39 }
 0x709   :  { %v2819_v40 = vpop.f32.mrb[16].mxu0 }
 0x70a   :  { %v2820_v41 = vpop.f32.mrb[17].mxu0 }
 0x70b   :  { %v2821_v44 = vadd.f32 %v2820_v41, %v2819_v40  ;;  %v2822_v45 = vpop.f32.mrb[18].mxu0 }
 0x70c   :  { %v2823_v29 = vpop.f32.mrb[19].mxu0 }
 0x70d   :  { %v2293_v48 = vadd.f32 %v2821_v44, %v2253_v43 }
 0x70f   :  { %v2298_v51 = vmax.f32 %v2293_v48, 0.0 }
 0x711   :  { %v2299_v52 = vpack.c.bf16 %v2298_v51, %v2298_v51 }
 0x713   :  { %2860 = vmatmul.mubr.bf16.vlgmr.msra.gmra.mrb[12].mxu1 %v2299_v52 }
 0x7e6   :  { %v2405_v37 = vpop.f32.mrb[12].mxu1 }
 0x7e7   :  { %v2406_v50 = vadd.f32 %v2713_v33, %v2405_v37  ;;  %v2861_v55 = vpop.f32.mrb[13].mxu1 }
 0x7e8   :  { %v2408_v56 = vpop.f32.mrb[14].mxu1 }
 0x7e9   :  { %v2411_v57 = vmax.f32 %v2406_v50, 0.0  ;;  %v2862_v0 = vpop.f32.mrb[15].mxu1 }
 0x7eb   :  { %v2412_v58 = vpack.c.bf16 %v2411_v57, %v2411_v57 }
 0x7ed   :  { %2880 = vmatmul.mubr.bf16.vlgmr.msra.gmra.mrb[20].mxu0 %v2412_v58 }
 0x8c0   :  { %v2518_v1 = vpop.f32.mrb[20].mxu0 }
 0x8c1   :  { %v2519_v62 = vadd.f32 %v2722_v59, %v2518_v1  ;;  %v2881_v63 = vpop.f32.mrb[21].mxu0 }
 0x8c2   :  { %v2521_v46 = vpop.f32.mrb[22].mxu0 }
 0x8c3   :  { %2524 = vst [vmem:[#allocation16] sm:$0x3] %v2519_v62  ;;  %v2882_v2 = vpop.f32.mrb[23].mxu0 }
 0x8c4   :  { %3364 = shalt.err (!%p3361_p12)
}
 0x8c5   :  { %s3365_s12 = scalar_lea.hbm %s3854_s13, 32 }
 0x8c6   :  { %p3366_p13 = scmp.ne.s32.totalorder %s3854_s13, %s3365_s12  ;;  %p3369_p0 = scmp.lt.u32.totalorder %s3365_s12, %s3854_s13 }
 0x8c8   :  { %p3371_p1 = pnand %p3369_p0, %p3366_p13 }
 0x8ca   :  { %3374 = shalt.err (!%p3371_p1)
}
 0x8cb   :  { %2534 = dma.vmem_to_hbm [thread:$0]  %s2532_s6, 32, %s3854_s13, [#allocation4]  }
 0x8cc   :  { %3385 = dma.done.wait [#allocation4], 32  }
 0x8cd   :  { %3386 = vsyncadd [#allocation4], 4294967264 }
 0x8ce   :  { %2538 = vsyncpa [#allocation3], 1 }
 0x8cf   :  { %2539 = vsyncpa [#allocation6], 1 }
 0x8d0   :  { %2540 = vsyncpa [#allocation9], 1 }
 0x8d1   :  { %2541 = vsyncpa [#allocation12], 1 }
 0x8d2   :  { %2542 = vsyncpa [#allocation15], 1 }
 0x8d3   :  { %2543 = vsyncpa [#allocation4], 1 }

</bundles_post_ra>
